<compile_context>
chip_gen: v7x
topology: tpu7x:2x2x1
jax: 0.10.0
libtpu: 0.0.40
codegen_flags: <defaults>
</compile_context>

<pallas_src>
import jax
import jax.numpy as jnp
from jax.experimental import pallas as pl
from jax.experimental.pallas import tpu as pltpu


def _spectral_ss_kernel(alpha_ref, w_ref, b_ref, ar_ref, a0_ref, out_ref):
    # alpha_ref : (1, 1)  f32 in SMEM   (PReLU shared parameter)
    # w_ref     : (C, C)  f32 in VMEM   (conv weight, native (C_out, C_in))
    # b_ref     : (C, 1)  f32 in VMEM   (conv bias, broadcast along lanes)
    # ar_ref    : (C, TN) tile of a_r   (channels on sublanes, positions on lanes)
    # a0_ref    : (C, TN) tile of a_0
    # out_ref   : (C, TN) tile of z
    alpha = alpha_ref[0, 0]

    x = ar_ref[...].astype(jnp.float32)
    # PReLU with a single shared parameter
    x = jnp.where(x >= 0.0, x, alpha * x)

    # 1x1 conv over channels: (C_out, C_in) @ (C_in, TN) on the MXU, + bias, ReLU
    m = jnp.dot(w_ref[...], x, preferred_element_type=jnp.float32) + b_ref[...]
    m = jnp.maximum(m, 0.0)

    half = m.shape[0] // 2
    e = a0_ref[...].astype(jnp.float32)
    m_r, m_i = m[:half, :], m[half:, :]
    e_r, e_i = e[:half, :], e[half:, :]

    # Complex multiply; write both halves directly (no concat temporary).
    out_ref[:half, :] = (m_r * e_r - m_i * e_i).astype(out_ref.dtype)
    out_ref[half:, :] = (m_r * e_i + m_i * e_r).astype(out_ref.dtype)


def spectral_ss(a_r, a_0, w, b, alpha, *, tile_n=2048):
    """a_r, a_0: (B, C, T, F) NCHW like PyTorch. Returns z: (B, C, T, F).

    Works for any even C; the complex split is fully aligned when C//2 is a
    multiple of 8 (e.g. the module default C=256). Activations may also be
    passed as bfloat16 to halve HBM traffic (compute stays in f32).
    """
    B, C, T, F = a_r.shape
    assert C % 2 == 0, "channels must be even (real/imag split)"
    assert tile_n % 128 == 0, "tile_n must be a multiple of 128 lanes"
    TF = T * F

    # Native NCHW layout: just collapse (T, F) -> TF. No HBM transposes.
    ar3 = a_r.reshape(B, C, TF)
    a03 = a_0.reshape(B, C, TF)

    # Largest lane tile <= tile_n that covers TF; pad TF up to a tile multiple.
    tile = min(tile_n, ((TF + 127) // 128) * 128)
    TFp = ((TF + tile - 1) // tile) * tile
    if TFp != TF:
        pad = ((0, 0), (0, 0), (0, TFp - TF))
        ar3 = jnp.pad(ar3, pad)
        a03 = jnp.pad(a03, pad)

    w2 = w.reshape(C, C).astype(jnp.float32)              # (C_out, C_in): W @ x
    b2 = b.reshape(C, 1).astype(jnp.float32)
    alpha2 = jnp.asarray(alpha, jnp.float32).reshape(1, 1)

    grid = (B, TFp // tile)

    # Explicit VMEM budget: double-buffered a_r / a_0 / z tiles, resident
    # weight+bias, plus headroom for in-kernel temporaries.  Capped at 48 MiB
    # so the same tile size is safe on v7x (64 MiB physical VMEM).
    itemsize = max(jnp.dtype(a_r.dtype).itemsize, 4)
    tile_bytes = C * tile * itemsize
    vmem_bytes = min(6 * tile_bytes + 2 * (C * C + C) * 4 + (16 << 20), 48 << 20)

    out = pl.pallas_call(
        _spectral_ss_kernel,
        out_shape=jax.ShapeDtypeStruct((B, C, TFp), a_r.dtype),
        grid_spec=pltpu.PrefetchScalarGridSpec(
            num_scalar_prefetch=0,
            grid=grid,
            in_specs=[
                pl.BlockSpec(memory_space=pltpu.MemorySpace.SMEM),      # alpha
                pl.BlockSpec((C, C), lambda bb, j: (0, 0)),             # weight (resident)
                pl.BlockSpec((C, 1), lambda bb, j: (0, 0)),             # bias   (resident)
                pl.BlockSpec((pl.Squeezed(), C, tile),
                             lambda bb, j: (bb, 0, j)),                 # a_r tile
                pl.BlockSpec((pl.Squeezed(), C, tile),
                             lambda bb, j: (bb, 0, j)),                 # a_0 tile
            ],
            out_specs=pl.BlockSpec((pl.Squeezed(), C, tile),
                                   lambda bb, j: (bb, 0, j)),
        ),
        compiler_params=pltpu.CompilerParams(
            dimension_semantics=("parallel", "parallel"),
            vmem_limit_bytes=vmem_bytes,
        ),
    )(alpha2, w2, b2, ar3, a03)

    # Drop lane padding (if any) and restore (B, C, T, F) -- a pure reshape.
    return out[:, :, :TF].reshape(B, C, T, F)


def spectral_ss_reference(a_r, a_0, w, b, alpha):
    """Pure-JAX reference mirroring the PyTorch forward exactly."""
    B, C, T, F = a_r.shape
    x = jnp.where(a_r >= 0.0, a_r, alpha * a_r)                       # PReLU
    m = jnp.einsum("bchw,oc->bohw", x, w.reshape(C, C)) + b[None, :, None, None]
    m = jnp.maximum(m, 0.0)                                           # ReLU
    h = C // 2
    m_r, m_i = m[:, :h], m[:, h:]
    e_r, e_i = a_0[:, :h], a_0[:, h:]
    z_r = m_r * e_r - m_i * e_i
    z_i = m_r * e_i + m_i * e_r
    return jnp.concatenate([z_r, z_i], axis=1)


if __name__ == "__main__":
    key = jax.random.PRNGKey(0)
    # Small but module-consistent shapes: C matches the default in_channels=256.
    # T*F = 160 deliberately exercises the pad-to-lane-tile path.
    B, C, T, F = 2, 256, 8, 20

    k1, k2, k3, k4 = jax.random.split(key, 4)
    a_r = jax.random.normal(k1, (B, C, T, F), jnp.float32)
    a_0 = jax.random.normal(k2, (B, C, T, F), jnp.float32)
    # Deterministic synthetic parameters (Conv2d(C, C, 1) weight/bias, PReLU alpha).
    w = jax.random.normal(k3, (C, C, 1, 1), jnp.float32) * 0.05
    b = jax.random.normal(k4, (C,), jnp.float32) * 0.05
    alpha = 0.25  # nn.PReLU default init

    z = spectral_ss(a_r, a_0, w, b, alpha)
    z = jax.block_until_ready(z)

    z_ref = spectral_ss_reference(a_r, a_0, w, b, alpha)
    assert z.shape == (B, C, T, F)
    err = jnp.max(jnp.abs(z - z_ref))
    assert jnp.allclose(z, z_ref, atol=1e-4, rtol=1e-4), f"max abs err {err}"

    print("KERNEL_OK")
</pallas_src>

<mosaic_0001>
module attributes {stable_mosaic.version = 11 : i64} {
  func.func @_spectral_ss_kernel(%arg0: i32, %arg1: i32, %arg2: memref<1x1xf32, #tpu.memory_space<smem>>, %arg3: memref<256x256xf32, #tpu.memory_space<vmem>>, %arg4: memref<256x1xf32, #tpu.memory_space<vmem>>, %arg5: memref<1x256x256xf32, #tpu.memory_space<vmem>>, %arg6: memref<1x256x256xf32, #tpu.memory_space<vmem>>, %arg7: memref<1x256x256xf32, #tpu.memory_space<vmem>>) attributes {dimension_semantics = [#tpu.dimension_semantics<parallel>, #tpu.dimension_semantics<parallel>], iteration_bounds = array<i64: 2, 1>, scalar_prefetch = 0 : i64, scratch_operands = 0 : i64, tpu.core_type = #tpu.core_type<tc>, window_params = [{transform_indices = @transform_0, window_bounds = array<i64: 1, 1>}, {pipeline_mode = #tpu.pipeline_mode<synchronous>, transform_indices = @transform_1, window_bounds = array<i64: 256, 256>}, {pipeline_mode = #tpu.pipeline_mode<synchronous>, transform_indices = @transform_2, window_bounds = array<i64: 256, 1>}, {transform_indices = @transform_3, window_bounds = array<i64: 1, 256, 256>}, {transform_indices = @transform_4, window_bounds = array<i64: 1, 256, 256>}, {transform_indices = @transform_5, window_bounds = array<i64: 1, 256, 256>}]} {
    %c0 = arith.constant 0 : index
    %c0_0 = arith.constant 0 : index
    %0 = memref.load %arg2[%c0, %c0_0] : memref<1x1xf32, #tpu.memory_space<smem>>
    %c0_1 = arith.constant 0 : index
    %c0_2 = arith.constant 0 : index
    %c0_3 = arith.constant 0 : index
    %1 = vector.load %arg5[%c0_1, %c0_2, %c0_3] : memref<1x256x256xf32, #tpu.memory_space<vmem>>, vector<1x256x256xf32>
    %2 = vector.shape_cast %1 : vector<1x256x256xf32> to vector<256x256xf32>
    %cst = arith.constant 0.000000e+00 : f32
    %3 = vector.broadcast %cst : f32 to vector<256x256xf32>
    %4 = arith.cmpf oge, %2, %3 : vector<256x256xf32>
    %5 = vector.broadcast %0 : f32 to vector<256x256xf32>
    %6 = arith.mulf %5, %2 : vector<256x256xf32>
    %7 = arith.select %4, %2, %6 : vector<256x256xi1>, vector<256x256xf32>
    %c0_4 = arith.constant 0 : index
    %c0_5 = arith.constant 0 : index
    %8 = vector.load %arg3[%c0_4, %c0_5] : memref<256x256xf32, #tpu.memory_space<vmem>>, vector<256x256xf32>
    %cst_6 = arith.constant dense<0.000000e+00> : vector<256x256xf32>
    %9 = tpu.matmul %8, %7, %cst_6 {dimension_numbers = #tpu.dot_dimension_numbers<[1], [0], [0], [1], [0, 0, 1, 1], [], []>} : vector<256x256xf32>, vector<256x256xf32>, vector<256x256xf32> -> vector<256x256xf32>
    %c0_7 = arith.constant 0 : index
    %c0_8 = arith.constant 0 : index
    %10 = vector.load %arg4[%c0_7, %c0_8] : memref<256x1xf32, #tpu.memory_space<vmem>>, vector<256x1xf32>
    %11 = vector.broadcast %10 : vector<256x1xf32> to vector<256x256xf32>
    %12 = arith.addf %9, %11 : vector<256x256xf32>
    %cst_9 = arith.constant 0.000000e+00 : f32
    %13 = vector.broadcast %cst_9 : f32 to vector<256x256xf32>
    %14 = arith.maximumf %12, %13 : vector<256x256xf32>
    %c0_10 = arith.constant 0 : index
    %c0_11 = arith.constant 0 : index
    %c0_12 = arith.constant 0 : index
    %15 = vector.load %arg6[%c0_10, %c0_11, %c0_12] : memref<1x256x256xf32, #tpu.memory_space<vmem>>, vector<1x256x256xf32>
    %16 = vector.shape_cast %15 : vector<1x256x256xf32> to vector<256x256xf32>
    %17 = vector.extract_strided_slice %14 {offsets = [0, 0], sizes = [128, 256], strides = [1, 1]} : vector<256x256xf32> to vector<128x256xf32>
    %18 = vector.extract_strided_slice %14 {offsets = [128, 0], sizes = [128, 256], strides = [1, 1]} : vector<256x256xf32> to vector<128x256xf32>
    %19 = vector.extract_strided_slice %16 {offsets = [0, 0], sizes = [128, 256], strides = [1, 1]} : vector<256x256xf32> to vector<128x256xf32>
    %20 = vector.extract_strided_slice %16 {offsets = [128, 0], sizes = [128, 256], strides = [1, 1]} : vector<256x256xf32> to vector<128x256xf32>
    %21 = arith.mulf %17, %19 : vector<128x256xf32>
    %22 = arith.mulf %18, %20 : vector<128x256xf32>
    %23 = arith.subf %21, %22 : vector<128x256xf32>
    %c0_13 = arith.constant 0 : index
    %c0_14 = arith.constant 0 : index
    %c0_15 = arith.constant 0 : index
    %24 = vector.load %arg7[%c0_13, %c0_14, %c0_15] : memref<1x256x256xf32, #tpu.memory_space<vmem>>, vector<1x128x256xf32>
    %25 = vector.shape_cast %24 : vector<1x128x256xf32> to vector<128x256xf32>
    %26 = vector.shape_cast %23 : vector<128x256xf32> to vector<1x128x256xf32>
    tpu.vector_store %arg7[%c0_13, %c0_14, %c0_15], %26 {strides = array<i32>} : memref<1x256x256xf32, #tpu.memory_space<vmem>>, vector<1x128x256xf32>,
    %27 = arith.mulf %17, %20 : vector<128x256xf32>
    %28 = arith.mulf %18, %19 : vector<128x256xf32>
    %29 = arith.addf %27, %28 : vector<128x256xf32>
    %c0_16 = arith.constant 0 : index
    %c128 = arith.constant 128 : index
    %c0_17 = arith.constant 0 : index
    %30 = vector.load %arg7[%c0_16, %c128, %c0_17] : memref<1x256x256xf32, #tpu.memory_space<vmem>>, vector<1x128x256xf32>
    %31 = vector.shape_cast %30 : vector<1x128x256xf32> to vector<128x256xf32>
    %32 = vector.shape_cast %29 : vector<128x256xf32> to vector<1x128x256xf32>
    tpu.vector_store %arg7[%c0_16, %c128, %c0_17], %32 {strides = array<i32>} : memref<1x256x256xf32, #tpu.memory_space<vmem>>, vector<1x128x256xf32>,
    return
  }
  func.func @transform_0(%arg0: i32, %arg1: i32) -> (i32, i32) {
    %c0_i32 = arith.constant 0 : i32
    %c0_i32_0 = arith.constant 0 : i32
    %c0_i32_1 = arith.constant 0 : i32
    return %c0_i32, %c0_i32_0 : i32, i32
  }
  func.func @transform_1(%arg0: i32, %arg1: i32) -> (i32, i32) {
    %c0_i32 = arith.constant 0 : i32
    %c0_i32_0 = arith.constant 0 : i32
    %c0_i32_1 = arith.constant 0 : i32
    return %c0_i32, %c0_i32_0 : i32, i32
  }
  func.func @transform_2(%arg0: i32, %arg1: i32) -> (i32, i32) {
    %c0_i32 = arith.constant 0 : i32
    %c0_i32_0 = arith.constant 0 : i32
    %c0_i32_1 = arith.constant 0 : i32
    return %c0_i32, %c0_i32_0 : i32, i32
  }
  func.func @transform_3(%arg0: i32, %arg1: i32) -> (i32, i32, i32) {
    %c0_i32 = arith.constant 0 : i32
    %c0_i32_0 = arith.constant 0 : i32
    return %arg0, %c0_i32, %arg1 : i32, i32, i32
  }
  func.func @transform_4(%arg0: i32, %arg1: i32) -> (i32, i32, i32) {
    %c0_i32 = arith.constant 0 : i32
    %c0_i32_0 = arith.constant 0 : i32
    return %arg0, %c0_i32, %arg1 : i32, i32, i32
  }
  func.func @transform_5(%arg0: i32, %arg1: i32) -> (i32, i32, i32) {
    %c0_i32 = arith.constant 0 : i32
    %c0_i32_0 = arith.constant 0 : i32
    return %arg0, %c0_i32, %arg1 : i32, i32, i32
  }
}

</mosaic_0001>

<bundles_post_ra>
// kernel: tpu_custom_call.1
= control target key start
LH: loop header
LB: loop body
LE: loop exit
PB: predicated region body
PF: predicated region fallthrough
CT: control target
= control target key end

     0   :  { %s2852_s0 = inlined_call_operand.<no memory space> [shape: f32[1,1], index: 0, kind: input, shape index: {}]   ;;  %s2853_s1 = inlined_call_operand.hbm [shape: f32[256,256], index: 1, kind: input, shape index: {}]   ;;  %s2854_s2 = inlined_call_operand.vmem [shape: f32[256,1], index: 2, kind: input, shape index: {}]   ;;  %s2855_s3 = inlined_call_operand.hbm [shape: f32[2,256,256], index: 3, kind: input, shape index: {}]   ;;  %s2856_s4 = inlined_call_operand.hbm [shape: f32[2,256,256], index: 4, kind: input, shape index: {}]   ;;  %s2857_s5 = inlined_call_operand.hbm [shape: f32[2,256,256], index: 5, kind: output, shape index: {}]  }
   0x1   :  { %10 = sst [smem:[#allocation2]] %s2852_s0 }
   0x2   :  { %11 = vsyncpa [#allocation4], 0 }
   0x3   :  { %12 = vsyncpa [#allocation7], 0 }
   0x4   :  { %14 = vsyncpa [#allocation7 + $0x1], 0 }
   0x5   :  { %15 = vsyncpa [#allocation5], 0 }
   0x6   :  { %17 = vsyncpa [#allocation5 + $0x1], 0  ;;  %s2037_s20 = smov 0   ;;  %s2039_s21 = smov 0  }
   0x7   :  { %s2041_s22 = smov 0   ;;  %s2043_s23 = smov 0  }
   0x8   :  { %s2045_s24 = smov 0   ;;  %s2047_s25 = smov 0  }
   0x9 LB: > { %s35_s0 = sadd.s32 1, %s1989_s24  ;;  %s107_s26 = sadd.s32 1, %s1981_s22  ;;  %s1993_s25 = sphi %s2047_s25, %s23_s25   ;;  %s1989_s24 = sphi %s2045_s24, %s2885_s24   ;;  %s1985_s23 = sphi %s2043_s23, %s2884_s23   ;;  %s1981_s22 = sphi %s2041_s22, %s2883_s22   ;;  %s1977_s21 = sphi %s2039_s21, %s2882_s21   ;;  %s1973_s20 = sphi %s2037_s20, %s2881_s20  }
   0xa   : > { %p37_p0 = scmp.ge.s32.totalorder %s35_s0, 2  ;;  %p114_p1 = scmp.ne.s32.totalorder %s1981_s22, %s1977_s21 }
   0xb   : > { %p115_p2 = scmp.eq.s32.totalorder %s1993_s25, 0  ;;  %p1760_p6 = scmp.lt.s32.totalorder %s1993_s25, 2 }
   0xc   : > { %s2887_s0 = smov (%p37_p0, %s35_s0), 0  ;;  %s219_s29 = sand.u32 1, %s1993_s25  }
   0xd   : > { %p2077_p3 = por %p115_p2, %p114_p1  ;;  %s102_s28 = ssub.s32 %s1989_s24, %s2887_s0 }
   0xe   : > { %p105_p5 = scmp.eq.s32.totalorder %s102_s28, 0  ;;  %s221_s30 = sand.u32 1, %s1981_s22  }
   0xf   : > { %s2090_s7 = sshll.u32 %s221_s30, 9  ;;  %s1635_s8 = sshll.u32 %s1989_s24, 13 }
  0x10   : > { %s2088_s6 = scalar_select %p105_p5, %s1981_s22, %s107_s26  }
  0x11   : > { %s2096_s11 = scalar_lea.hbm %s2855_s3, %s1635_s8  ;;  %s223_s12 = scalar_lea.vmem [#allocation6], %s2090_s7 }
  0x12   : > { %s232_s13 = sshll.u32 %s223_s12, 4  ;;  %p2103_p7 = pnand %p1760_p6, %p2077_p3  ;;  %s2099_s13 = int_to_ptr.vmem [resolvable:$true] %s232_s13 }
  0x13   : > { %s2110_s17 = scalar_lea.hbm %s2856_s4, %s1635_s8  ;;  %s2112_s18 = scalar_lea.sflag [#allocation7], %s219_s29 }
  0x14   : > { %s1819_s19 = scalar_lea.hbm %s2096_s11, 8192  ;;  %p1821_p9 = pneg %p2103_p7 }
  0x15   : > { %p1820_p8 = scmp.ne.s32.totalorder %s2096_s11, %s1819_s19  ;;  %s1824_s28 = scalar_lea.hbm %s2855_s3, 16384 }
  0x16   : > { %p1825_p12 = scmp.lt.u32.totalorder %s2096_s11, %s2855_s3  ;;  %p1826_p13 = scmp.lt.u32.totalorder %s1824_s28, %s1819_s19 }
  0x17   : > { %p1822_p10 = pnand %p1821_p9, %p1820_p8  ;;  %p1828_p2 = scmp.lt.u32.totalorder %s1819_s19, %s2096_s11 }
  0x18   : > { %p1827_p0 = por %p1826_p13, %p1825_p12 }
  0x19   : > { %p1823_p11 = pneg %p1822_p10 }
  0x1a   : > { %p1829_p3 = por %p1828_p2, %p1827_p0 }
  0x1c   : > { %p1830_p5 = pnand %p1829_p3, %p1823_p11 }
  0x1e   : > { %1833 = shalt.err (!%p1830_p5)
}
  0x1f   : > { %s1834_s29 = scalar_lea.vmem %s2099_s13, 8192  ;;  %s1995_s8 = smov [#allocation6]  }
  0x20   : > { %p1835_p6 = scmp.ne.s32.totalorder %s2099_s13, %s1834_s29  ;;  %s1839_s10 = sshll.u32 %s1995_s8, 4  ;;  %s1840_s10 = int_to_ptr.vmem [resolvable:$false] %s1839_s10 }
  0x21   : > { %s1841_s12 = scalar_lea.vmem %s1840_s10, 16384  ;;  %p1842_p4 = scmp.lt.s32.totalorder %s2099_s13, %s1840_s10 }
  0x22   : > { %p1837_p8 = pnand %p1835_p6, %p1821_p9  ;;  %p1843_p12 = scmp.lt.s32.totalorder %s1841_s12, %s1834_s29 }
  0x24   : > { %p1838_p10 = pneg %p1837_p8  ;;  %p1844_p13 = por %p1843_p12, %p1842_p4 }
  0x26   : > { %p1845_p0 = pnand %p1844_p13, %p1838_p10 }
  0x28   : > { %1848 = shalt.err (!%p1845_p0)
}
  0x29   : > { %s2858_s15 = smov 256   ;;  %s1997_s16 = smov 16  }
  0x2a   : > { %1751 = dma.hbm_to_vmem [thread:$0]  (!%p2103_p7), %s2096_s11, 8192, %s2099_s13, %s2112_s18, %s2858_s15, %s2858_s15, %s1997_s16  }
  0x2b   : > { %s246_s19 = scalar_lea.vmem [#allocation8], %s2090_s7  ;;  %s2145_s27 = sadd.s32 4294967295, %s1993_s25  }
  0x2c   : > { %s255_s26 = sshll.u32 %s246_s19, 4  ;;  %s1615_s28 = sadd.s32 4294967294, %s1993_s25   ;;  %s2171_s26 = int_to_ptr.vmem [resolvable:$true] %s255_s26 }
  0x2d   : > { %p120_p4 = scmp.ne.s32.totalorder %s1977_s21, %s1973_s20  ;;  %p2860_p11 = scmp.eq.s32.totalorder %s2145_s27, 0 }
  0x2e   : > { %p174_p2 = scmp.eq.s32.totalorder %s2145_s27, 1  ;;  %p180_p3 = scmp.eq.s32.totalorder %s1615_s28, 1 }
  0x2f   : > { %p1616_p5 = scmp.ge.s32.totalorder %s1993_s25, 1  ;;  %p2155_p6 = por %p2860_p11, %p120_p4 }
  0x30   : > { %p2162_p8 = por %p174_p2, %p114_p1  ;;  %p2166_p10 = por %p180_p3, %p120_p4 }
  0x31   : > { %s2866_s11 = scalar_select %p2155_p6, 1, 0 }
  0x32   : > { %s2867_s7 = scalar_select %p2162_p8, 1, 0 }
  0x33   : > { %s2868_s13 = scalar_select %p2166_p10, 1, 0 }
  0x34   : > { %p187_p12 = scmp.lt.s32.totalorder %s1993_s25, 3  ;;  %s1998_s9 = smov [#allocation3]  }
  0x35   : > { %s2177_s29 = sshll.u32 %s1998_s9, 4  ;;  %s1849_s8 = scalar_lea.hbm %s2110_s17, 8192  ;;  %s203_s29 = int_to_ptr.vmem [resolvable:$true] %s2177_s29 }
  0x36   : > { %p2173_p13 = pnand %p1616_p5, %p187_p12  ;;  %p1850_p0 = scmp.ne.s32.totalorder %s2110_s17, %s1849_s8 }
  0x37   : > { %s1854_s19 = scalar_lea.hbm %s2856_s4, 16384  ;;  %p1855_p3 = scmp.lt.u32.totalorder %s2110_s17, %s2856_s4 }
  0x38   : > { %s2869_s30 = scalar_select %p2173_p13, 1, 0 }
  0x39   : > { %p1852_p4 = pnand %p1850_p0, %p1821_p9  ;;  %p1856_p5 = scmp.lt.u32.totalorder %s1854_s19, %s1849_s8 }
  0x3a   : > { %p1858_p11 = scmp.lt.u32.totalorder %s1849_s8, %s2110_s17 }
  0x3b   : > { %p1853_p2 = pneg %p1852_p4  ;;  %p1857_p12 = por %p1856_p5, %p1855_p3 }
  0x3d   : > { %p1859_p10 = por %p1858_p11, %p1857_p12 }
  0x3f   : > { %p1860_p8 = pnand %p1859_p10, %p1853_p2 }
  0x41   : > { %1863 = shalt.err (!%p1860_p8)
}
  0x42   : > { %s1864_s9 = scalar_lea.vmem %s2171_s26, 8192  ;;  %s1999_s10 = smov [#allocation8]  }
  0x43   : > { %p1865_p0 = scmp.ne.s32.totalorder %s2171_s26, %s1864_s9  ;;  %s1869_s12 = sshll.u32 %s1999_s10, 4  ;;  %s1870_s12 = int_to_ptr.vmem [resolvable:$false] %s1869_s12 }
  0x44   : > { %s1871_s15 = scalar_lea.vmem %s1870_s12, 16384  ;;  %p1872_p6 = scmp.lt.s32.totalorder %s2171_s26, %s1870_s12 }
  0x45   : > { %p1867_p4 = pnand %p1865_p0, %p1821_p9  ;;  %p1873_p3 = scmp.lt.s32.totalorder %s1871_s15, %s1864_s9 }
  0x47   : > { %p1868_p1 = pneg %p1867_p4  ;;  %p1874_p5 = por %p1873_p3, %p1872_p6 }
  0x49   : > { %p1875_p11 = pnand %p1874_p5, %p1868_p1 }
  0x4b   : > { %1878 = shalt.err (!%p1875_p11)
}
  0x4c   : > { %s2870_s8 = smov 256   ;;  %p2871_p9 = scmp.eq.s32.totalorder %s2145_s27, 0 }
  0x4d   : > { %1754 = dma.hbm_to_vmem [thread:$0]  (!%p2103_p7), %s2110_s17, 8192, %s2171_s26, %s2112_s18, %s2870_s8, %s2870_s8, %s1997_s16  }
  0x4e   : > { %p2872_p8 = pneg %p2173_p13  ;;  %s1879_s9 = scalar_lea.hbm %s2853_s1, 8192 }
  0x4f   : > { %p1880_p6 = scmp.ne.s32.totalorder %s2853_s1, %s1879_s9  ;;  %p1886_p12 = scmp.lt.u32.totalorder %s1879_s9, %s2853_s1 }
  0x50   : > { %p2214_p10 = pnand %p2872_p8, %p2871_p9 }
  0x52   : > { %p1881_p1 = pneg %p2214_p10 }
  0x54   : > { %p1882_p7 = pnand %p1881_p1, %p1880_p6 }
  0x56   : > { %p1883_p2 = pneg %p1882_p7 }
  0x58   : > { %p1888_p0 = pnand %p1886_p12, %p1883_p2 }
  0x5a   : > { %1891 = shalt.err (!%p1888_p0)
}
  0x5b   : > { %s1892_s26 = scalar_lea.vmem %s203_s29, 8192  ;;  %p1900_p11 = scmp.lt.s32.totalorder %s203_s29, %s203_s29 }
  0x5c   : > { %p1893_p4 = scmp.ne.s32.totalorder %s203_s29, %s1892_s26  ;;  %p1901_p9 = scmp.lt.s32.totalorder %s1892_s26, %s1892_s26 }
  0x5e   : > { %p1895_p3 = pnand %p1893_p4, %p1881_p1  ;;  %p1902_p8 = por %p1901_p9, %p1900_p11 }
  0x60   : > { %p1896_p5 = pneg %p1895_p3 }
  0x62   : > { %p1903_p13 = pnand %p1902_p8, %p1896_p5 }
  0x64   : > { %1906 = shalt.err (!%p1903_p13)
}
  0x65   : > { %1747 = dma.hbm_to_vmem [thread:$0]  (!%p2214_p10), %s2853_s1, 8192, %s203_s29, [#allocation4], %s2870_s8, %s2870_s8, %s1997_s16  }
  0x66   : > { %p2874_p6 = scmp.ne.s32.totalorder %s2869_s30, 0 }
  0x67   : > { %p2875_p1 = scmp.eq.s32.totalorder (!%p2874_p6), %s2145_s27, 0 }
  0x68   : > { %267 = sbr.rel (%p2874_p6) target bundleno = 509 (0x1fd), region = 40 }
  0x6f   : > { %1960 = dma.done.wait (%p2875_p1), [#allocation4], 8192   ;;  %p2876_p7 = pmov %p2875_p1 }
  0x70   : > { %s273_s19 = sand.u32 1, %s2145_s27   ;;  %s275_s14 = sand.u32 1, %s1977_s21  }
  0x71   : > { %1962 = vsyncadd (%p2876_p7), [#allocation4], 4294959104  ;;  %s2247_s9 = sshll.u32 %s275_s14, 9  ;;  %s274_s16 = scalar_lea.sflag [#allocation7], %s273_s19 }
  0x72   : > { %s2250_s29 = scalar_lea.vmem [#allocation6], %s2247_s9  ;;  %p2877_p13 = scmp.ne.s32.totalorder %s2866_s11, 0 }
  0x74   : > { %1964 = dma.done.wait (%p2877_p13), %s274_s16, 16384  }
  0x75   : > { %1966 = vsyncadd (%p2877_p13), %s274_s16, 4294950912  ;;  %s321_s27 = sld [smem:[#allocation2]]  ;;  %v2000_v0 = vmov 0   ;;  %v323_v1 = vld [vmem:[%s2250_s29 + $0x8] sm:$0xff]  ;;  %v325_v2 = vld [vmem:[%s2250_s29 + $0x18] sm:$0xff]  ;;  %s2561_s28 = scalar_lea.vmem [#allocation8], %s2247_s9 }
  0x76   : > { %1818 = vset.pattern.permute.xlu1 %v2000_v0  ;;  %1817 = vset.pattern.permute.xlu0 %v2000_v0  ;;  %v322_v4 = vld [vmem:[%s2250_s29] sm:$0xff]  ;;  %vm387_vm0 = vcmp.ge.f32.partialorder %v323_v1, 0.0  ;;  %vm389_vm1 = vcmp.ge.f32.partialorder %v325_v2, 0.0  ;;  %v324_v7 = vld [vmem:[%s2250_s29 + $0x10] sm:$0xff]  ;;  %v327_v8 = vld [vmem:[%s2250_s29 + $0x28] sm:$0xff]  ;;  %s2570_s19 = scalar_lea.vmem [#allocation9], %s2247_s9 }
  0x77   : > { %v329_v9 = vld [vmem:[%s2250_s29 + $0x38] sm:$0xff]  ;;  %vm386_vm2 = vcmp.ge.f32.partialorder %v322_v4, 0.0  ;;  %vm388_vm3 = vcmp.ge.f32.partialorder %v324_v7, 0.0  ;;  %v326_v12 = vld [vmem:[%s2250_s29 + $0x20] sm:$0xff]  ;;  %v328_v13 = vld [vmem:[%s2250_s29 + $0x30] sm:$0xff]  ;;  %vm391_vm4 = vcmp.ge.f32.partialorder %v327_v8, 0.0 }
  0x78   : > { %vm393_vm5 = vcmp.ge.f32.partialorder %v329_v9, 0.0  ;;  %v331_v16 = vld [vmem:[%s2250_s29 + $0x48] sm:$0xff]  ;;  %v333_v21 = vld [vmem:[%s2250_s29 + $0x58] sm:$0xff]  ;;  %vm390_vm6 = vcmp.ge.f32.partialorder %v326_v12, 0.0  ;;  %vm392_vm7 = vcmp.ge.f32.partialorder %v328_v13, 0.0  ;;  %v330_v24 = vld [vmem:[%s2250_s29 + $0x40] sm:$0xff] }
  0x79   : > { %vm395_vm8 = vcmp.ge.f32.partialorder %v331_v16, 0.0  ;;  %v332_v28 = vld [vmem:[%s2250_s29 + $0x50] sm:$0xff]  ;;  %vm397_vm9 = vcmp.ge.f32.partialorder %v333_v21, 0.0  ;;  %v335_v32 = vld [vmem:[%s2250_s29 + $0x68] sm:$0xff]  ;;  %vm394_vm10 = vcmp.ge.f32.partialorder %v330_v24, 0.0  ;;  %v337_v36 = vld [vmem:[%s2250_s29 + $0x78] sm:$0xff] }
  0x7a   : > { %v334_v37 = vld [vmem:[%s2250_s29 + $0x60] sm:$0xff]  ;;  %vm396_vm11 = vcmp.ge.f32.partialorder %v332_v28, 0.0  ;;  %v336_v41 = vld [vmem:[%s2250_s29 + $0x70] sm:$0xff]  ;;  %vm399_vm12 = vcmp.ge.f32.partialorder %v335_v32, 0.0  ;;  %vm401_vm13 = vcmp.ge.f32.partialorder %v337_v36, 0.0  ;;  %v339_v47 = vld [vmem:[%s2250_s29 + $0x88] sm:$0xff] }
  0x7b   : > { %v2258_v3 = vstv %s321_s27  ;;  %vm398_vm14 = vcmp.ge.f32.partialorder %v334_v37, 0.0  ;;  %v341_v48 = vld [vmem:[%s2250_s29 + $0x98] sm:$0xff]  ;;  %vm400_vm15 = vcmp.ge.f32.partialorder %v336_v41, 0.0  ;;  %v338_v52 = vld [vmem:[%s2250_s29 + $0x80] sm:$0xff]  ;;  %v340_v57 = vld [vmem:[%s2250_s29 + $0x90] sm:$0xff]  ;;  %s1637_s9 = sshll.u32 %s1985_s23, 13 }
  0x7c   : > { %v452_v5 = vmul.f32 %v2258_v3, %v323_v1  ;;  %v454_v6 = vmul.f32 %v2258_v3, %v325_v2  ;;  %v451_v10 = vmul.f32 %v2258_v3, %v322_v4  ;;  %v453_v11 = vmul.f32 %v2258_v3, %v324_v7  ;;  %v343_v60 = vld [vmem:[%s2250_s29 + $0xa8] sm:$0xff]  ;;  %v345_v61 = vld [vmem:[%s2250_s29 + $0xb8] sm:$0xff]  ;;  %s1492_s16 = sshll.u32 %s2570_s19, 4  ;;  %s2795_s23 = scalar_lea.hbm %s2857_s5, %s1637_s9  ;;  %s2797_s16 = int_to_ptr.vmem [resolvable:$true] %s1492_s16 }
  0x7d   : > { %v456_v20 = vmul.f32 %v2258_v3, %v327_v8  ;;  %v458_v23 = vmul.f32 %v2258_v3, %v329_v9  ;;  %v455_v26 = vmul.f32 %v2258_v3, %v326_v12  ;;  %v457_v27 = vmul.f32 %v2258_v3, %v328_v13  ;;  %s2805_s30 = scalar_lea.sflag [#allocation5], %s275_s14  ;;  %p2878_p2 = scmp.ne.s32.totalorder %s2867_s7, 0 }
  0x7e   : > { %v516_v14 = vsel %vm387_vm0, %v323_v1, %v452_v5  ;;  %v518_v15 = vsel %vm389_vm1, %v325_v2, %v454_v6  ;;  %v515_v18 = vsel %vm386_vm2, %v322_v4, %v451_v10  ;;  %v517_v19 = vsel %vm388_vm3, %v324_v7, %v453_v11  ;;  %v342_v5 = vld [vmem:[%s2250_s29 + $0xa0] sm:$0xff]  ;;  %v344_v6 = vld [vmem:[%s2250_s29 + $0xb0] sm:$0xff]  ;;  %s2001_s8 = smov [#allocation9]  }
  0x7f   : > { %v1638_v17 = vpack.c.bf16 %v518_v15, %v516_v14  ;;  %v1640_v22 = vpack.c.bf16 %v517_v19, %v515_v18  ;;  %v520_v25 = vsel %vm391_vm4, %v327_v8, %v456_v20  ;;  %v522_v29 = vsel %vm393_vm5, %v329_v9, %v458_v23  ;;  %v347_v9 = vld [vmem:[%s2250_s29 + $0xc8] sm:$0xff]  ;;  %v349_v14 = vld [vmem:[%s2250_s29 + $0xd8] sm:$0xff]  ;;  %s1911_s10 = sshll.u32 %s2001_s8, 4  ;;  %s1912_s10 = int_to_ptr.vmem [resolvable:$false] %s1911_s10 }
  0x80   : > { %v460_v30 = vmul.f32 %v2258_v3, %v331_v16  ;;  %v462_v31 = vmul.f32 %v2258_v3, %v333_v21  ;;  %v1642_v33 = vpack.c.bf16 %v522_v29, %v520_v25  ;;  %v519_v34 = vsel %vm390_vm6, %v326_v12, %v455_v26  ;;  %v351_v25 = vld [vmem:[%s2250_s29 + $0xe8] sm:$0xff]  ;;  %s1913_s12 = scalar_lea.vmem %s1912_s10, 16384  ;;  %p1914_p4 = scmp.lt.s32.totalorder %s2797_s16, %s1912_s10 }
  0x81   : > { %1639 = vmatprep.subr.bf16.mxu0 %v1638_v17  ;;  %1702 = vmatprep.subr.bf16.mxu1 %v1638_v17  ;;  %v521_v35 = vsel %vm392_vm7, %v328_v13, %v457_v27  ;;  %v459_v43 = vmul.f32 %v2258_v3, %v330_v24  ;;  %v461_v44 = vmul.f32 %v2258_v3, %v332_v28  ;;  %vm403_vm0 = vcmp.ge.f32.partialorder %v339_v47, 0.0  ;;  %v346_v17 = vld [vmem:[%s2250_s29 + $0xc0] sm:$0xff]  ;;  %v580_v26 = vld [vmem:[#allocation3 + $0x8] sm:$0xff] }
  0x82   : > { %1641 = vmatpush1.bf16.msra.mxu0 %v1640_v22  ;;  %1718 = vmatpush1.bf16.msra.mxu1 %v1640_v22  ;;  %v1644_v38 = vpack.c.bf16 %v521_v35, %v519_v34  ;;  %v524_v39 = vsel %vm395_vm8, %v331_v16, %v460_v30  ;;  %v526_v40 = vsel %vm397_vm9, %v333_v21, %v462_v31  ;;  %vm405_vm1 = vcmp.ge.f32.partialorder %v341_v48, 0.0  ;;  %v348_v21 = vld [vmem:[%s2250_s29 + $0xd0] sm:$0xff]  ;;  %v612_v27 = vld [vmem:[#allocation3 + $0x108] sm:$0xff]  ;;  %v353_v31 = vld [vmem:[%s2250_s29 + $0xf8] sm:$0xff] }
  0x83   : > { %1643 = vmatprep.subr.bf16.mxu0 %v1642_v33  ;;  %1703 = vmatprep.subr.bf16.mxu1 %v1642_v33  ;;  %v1646_v42 = vpack.c.bf16 %v526_v40, %v524_v39  ;;  %v464_v45 = vmul.f32 %v2258_v3, %v335_v32  ;;  %v466_v46 = vmul.f32 %v2258_v3, %v337_v36  ;;  %vm402_vm2 = vcmp.ge.f32.partialorder %v338_v52, 0.0  ;;  %v355_v40 = vld [vmem:[%s2250_s29 + $0x108] sm:$0xff] }
  0x84   : > { %v523_v49 = vsel %vm394_vm10, %v330_v24, %v459_v43  ;;  %v525_v50 = vsel %vm396_vm11, %v332_v28, %v461_v44  ;;  %v463_v51 = vmul.f32 %v2258_v3, %v334_v37  ;;  %v465_v56 = vmul.f32 %v2258_v3, %v336_v41  ;;  %899 = vmatprep.mubr.f32.mxu0 %v580_v26  ;;  %v357_v43 = vld [vmem:[%s2250_s29 + $0x118] sm:$0xff] }
  0x85   : > { %v1648_v53 = vpack.c.bf16 %v525_v50, %v523_v49  ;;  %v528_v54 = vsel %vm399_vm12, %v335_v32, %v464_v45  ;;  %v530_v55 = vsel %vm401_vm13, %v337_v36, %v466_v46  ;;  %v468_v63 = vmul.f32 %v2258_v3, %v339_v47  ;;  %v350_v32 = vld [vmem:[%s2250_s29 + $0xe0] sm:$0xff]  ;;  %995 = vmatprep.mubr.f32.mxu1 %v612_v27  ;;  %v352_v36 = vld [vmem:[%s2250_s29 + $0xf0] sm:$0xff] }
  0x86   : > { %1645 = vmatpush1.bf16.msra.mxu0 %v1644_v38  ;;  %1719 = vmatpush1.bf16.msra.mxu1 %v1644_v38  ;;  %v1650_v58 = vpack.c.bf16 %v530_v55, %v528_v54  ;;  %v527_v59 = vsel %vm398_vm14, %v334_v37, %v463_v51  ;;  %v529_v62 = vsel %vm400_vm15, %v336_v41, %v465_v56  ;;  %vm404_vm3 = vcmp.ge.f32.partialorder %v340_v57, 0.0  ;;  %v361_v56 = vld [vmem:[%s2250_s29 + $0x138] sm:$0xff] }
  0x87   : > { %1647 = vmatprep.subr.bf16.mxu0 %v1646_v42  ;;  %1704 = vmatprep.subr.bf16.mxu1 %v1646_v42  ;;  %v470_v0 = vmul.f32 %v2258_v3, %v341_v48  ;;  %v1652_v1 = vpack.c.bf16 %v529_v62, %v527_v59  ;;  %v467_v2 = vmul.f32 %v2258_v3, %v338_v52  ;;  %vm407_vm4 = vcmp.ge.f32.partialorder %v343_v60, 0.0  ;;  %v358_v59 = vld [vmem:[%s2250_s29 + $0x120] sm:$0xff] }
  0x88   : > { %v469_v4 = vmul.f32 %v2258_v3, %v340_v57  ;;  %v532_v7 = vsel %vm403_vm0, %v339_v47, %v468_v63  ;;  %vm409_vm5 = vcmp.ge.f32.partialorder %v345_v61, 0.0  ;;  %v472_v13 = vmul.f32 %v2258_v3, %v343_v60  ;;  %v354_v47 = vld [vmem:[%s2250_s29 + $0x100] sm:$0xff]  ;;  %v360_v63 = vld [vmem:[%s2250_s29 + $0x130] sm:$0xff] }
  0x89   : > { %v534_v8 = vsel %vm405_vm1, %v341_v48, %v470_v0  ;;  %v531_v11 = vsel %vm402_vm2, %v338_v52, %v467_v2  ;;  %v474_v16 = vmul.f32 %v2258_v3, %v345_v61  ;;  %vm406_vm6 = vcmp.ge.f32.partialorder %v342_v5, 0.0  ;;  %v356_v48 = vld [vmem:[%s2250_s29 + $0x110] sm:$0xff]  ;;  %v359_v52 = vld [vmem:[%s2250_s29 + $0x128] sm:$0xff] }
  0x8a   : > { %1649 = vmatpush1.bf16.msra.mxu0 %v1648_v53  ;;  %1720 = vmatpush1.bf16.msra.mxu1 %v1648_v53  ;;  %v1654_v10 = vpack.c.bf16 %v534_v8, %v532_v7  ;;  %v533_v12 = vsel %vm404_vm3, %v340_v57, %v469_v4  ;;  %vm408_vm7 = vcmp.ge.f32.partialorder %v344_v6, 0.0  ;;  %v536_v18 = vsel %vm407_vm4, %v343_v60, %v472_v13  ;;  %v645_v0 = vld [vmem:[%s2854_s2 + $0x10] sm:$0xff]  ;;  %v643_v7 = vld [vmem:[%s2854_s2] sm:$0xff] }
  0x8b   : > { %1651 = vmatprep.subr.bf16.mxu0 %v1650_v58  ;;  %1705 = vmatprep.subr.bf16.mxu1 %v1650_v58  ;;  %v1656_v15 = vpack.c.bf16 %v533_v12, %v531_v11  ;;  %v471_v19 = vmul.f32 %v2258_v3, %v342_v5  ;;  %v473_v20 = vmul.f32 %v2258_v3, %v344_v6  ;;  %vm411_vm8 = vcmp.ge.f32.partialorder %v347_v9, 0.0  ;;  %v362_v11 = vld [vmem:[%s2250_s29 + $0x140] sm:$0xff] }
  0x8c   : > { %v538_v22 = vsel %vm409_vm5, %v345_v61, %v474_v16  ;;  %vm413_vm9 = vcmp.ge.f32.partialorder %v349_v14, 0.0  ;;  %v476_v23 = vmul.f32 %v2258_v3, %v347_v9  ;;  %v478_v24 = vmul.f32 %v2258_v3, %v349_v14  ;;  %687 = vperm.xlu1 %1818, %v645_v0   ;;  %677 = vperm.xlu0 %1817, %v643_v7  }
  0x8d   : > { %v1658_v28 = vpack.c.bf16 %v538_v22, %v536_v18  ;;  %v535_v29 = vsel %vm406_vm6, %v342_v5, %v471_v19  ;;  %v537_v30 = vsel %vm408_vm7, %v344_v6, %v473_v20  ;;  %vm410_vm10 = vcmp.ge.f32.partialorder %v346_v17, 0.0  ;;  %v363_v5 = vld [vmem:[%s2250_s29 + $0x148] sm:$0xff]  ;;  %v365_v6 = vld [vmem:[%s2250_s29 + $0x158] sm:$0xff] }
  0x8e   : > { %1653 = vmatpush1.bf16.msra.mxu0 %v1652_v1  ;;  %1721 = vmatpush1.bf16.msra.mxu1 %v1652_v1  ;;  %v1660_v33 = vpack.c.bf16 %v537_v30, %v535_v29  ;;  %v540_v34 = vsel %vm411_vm8, %v347_v9, %v476_v23  ;;  %v542_v35 = vsel %vm413_vm9, %v349_v14, %v478_v24  ;;  %vm412_vm11 = vcmp.ge.f32.partialorder %v348_v21, 0.0  ;;  %v646_v18 = vld [vmem:[%s2854_s2 + $0x18] sm:$0xff]  ;;  %v367_v22 = vld [vmem:[%s2250_s29 + $0x168] sm:$0xff] }
  0x8f   : > { %1655 = vmatprep.subr.bf16.mxu0 %v1654_v10  ;;  %1706 = vmatprep.subr.bf16.mxu1 %v1654_v10  ;;  %v1662_v37 = vpack.c.bf16 %v542_v35, %v540_v34  ;;  %v475_v38 = vmul.f32 %v2258_v3, %v346_v17  ;;  %v477_v39 = vmul.f32 %v2258_v3, %v348_v21  ;;  %vm415_vm12 = vcmp.ge.f32.partialorder %v351_v25, 0.0  ;;  %v369_v23 = vld [vmem:[%s2250_s29 + $0x178] sm:$0xff]  ;;  %v644_v24 = vld [vmem:[%s2854_s2 + $0x8] sm:$0xff] }
  0x90   : > { %vm417_vm13 = vcmp.ge.f32.partialorder %v353_v31, 0.0  ;;  %v480_v41 = vmul.f32 %v2258_v3, %v351_v25  ;;  %v482_v42 = vmul.f32 %v2258_v3, %v353_v31  ;;  %vm414_vm14 = vcmp.ge.f32.partialorder %v350_v32, 0.0  ;;  %692 = vperm.xlu1 %1818, %v646_v18   ;;  %682 = vperm.xlu0 %1817, %v644_v24   ;;  %v383_v24 = vld [vmem:[%s2250_s29 + $0x1e8] sm:$0xff] }
  0x91   : > { %v539_v44 = vsel %vm410_vm10, %v346_v17, %v475_v38  ;;  %v541_v45 = vsel %vm412_vm11, %v348_v21, %v477_v39  ;;  %vm416_vm15 = vcmp.ge.f32.partialorder %v352_v36, 0.0  ;;  %v479_v46 = vmul.f32 %v2258_v3, %v350_v32 }
  0x92   : > { %1657 = vmatpush1.bf16.msra.mxu0 %v1656_v15  ;;  %1722 = vmatpush1.bf16.msra.mxu1 %v1656_v15  ;;  %v1664_v49 = vpack.c.bf16 %v541_v45, %v539_v44  ;;  %v544_v50 = vsel %vm415_vm12, %v351_v25, %v480_v41  ;;  %v546_v51 = vsel %vm417_vm13, %v353_v31, %v482_v42  ;;  %vm419_vm0 = vcmp.ge.f32.partialorder %v355_v40, 0.0  ;;  %v364_v15 = vld [vmem:[%s2250_s29 + $0x150] sm:$0xff]  ;;  %v373_v41 = vld [vmem:[%s2250_s29 + $0x198] sm:$0xff]  ;;  %v647_v42 = vld [vmem:[%s2854_s2 + $0x20] sm:$0xff] }
  0x93   : > { %1659 = vmatprep.subr.bf16.mxu0 %v1658_v28  ;;  %1707 = vmatprep.subr.bf16.mxu1 %v1658_v28  ;;  %v1666_v53 = vpack.c.bf16 %v546_v51, %v544_v50  ;;  %v481_v54 = vmul.f32 %v2258_v3, %v352_v36  ;;  %v543_v55 = vsel %vm414_vm14, %v350_v32, %v479_v46  ;;  %vm421_vm1 = vcmp.ge.f32.partialorder %v357_v43, 0.0  ;;  %v366_v28 = vld [vmem:[%s2250_s29 + $0x160] sm:$0xff]  ;;  %v372_v51 = vld [vmem:[%s2250_s29 + $0x190] sm:$0xff] }
  0x94   : > { %v484_v57 = vmul.f32 %v2258_v3, %v355_v40  ;;  %v486_v58 = vmul.f32 %v2258_v3, %v357_v43  ;;  %vm418_vm2 = vcmp.ge.f32.partialorder %v354_v47, 0.0  ;;  %vm420_vm3 = vcmp.ge.f32.partialorder %v356_v48, 0.0  ;;  %v370_v50 = vld [vmem:[%s2250_s29 + $0x180] sm:$0xff]  ;;  %697 = vperm.xlu0 %1817, %v647_v42  }
  0x95   : > { %v545_v60 = vsel %vm416_vm15, %v352_v36, %v481_v54  ;;  %v483_v61 = vmul.f32 %v2258_v3, %v354_v47  ;;  %v485_v62 = vmul.f32 %v2258_v3, %v356_v48  ;;  %vm423_vm4 = vcmp.ge.f32.partialorder %v359_v52, 0.0  ;;  %v648_v36 = vld [vmem:[%s2854_s2 + $0x28] sm:$0xff]  ;;  %v655_v42 = vld [vmem:[%s2854_s2 + $0x60] sm:$0xff] }
  0x96   : > { %1661 = vmatpush1.bf16.msra.mxu0 %v1660_v33  ;;  %1723 = vmatpush1.bf16.msra.mxu1 %v1660_v33  ;;  %v1668_v1 = vpack.c.bf16 %v545_v60, %v543_v55  ;;  %v548_v2 = vsel %vm419_vm0, %v355_v40, %v484_v57  ;;  %v550_v4 = vsel %vm421_vm1, %v357_v43, %v486_v58  ;;  %vm425_vm5 = vcmp.ge.f32.partialorder %v361_v56, 0.0  ;;  %v368_v33 = vld [vmem:[%s2250_s29 + $0x170] sm:$0xff]  ;;  %v371_v40 = vld [vmem:[%s2250_s29 + $0x188] sm:$0xff]  ;;  %v377_v55 = vld [vmem:[%s2250_s29 + $0x1b8] sm:$0xff] }
  0x97   : > { %1663 = vmatprep.subr.bf16.mxu0 %v1662_v37  ;;  %1708 = vmatprep.subr.bf16.mxu1 %v1662_v37  ;;  %v1670_v8 = vpack.c.bf16 %v550_v4, %v548_v2  ;;  %v547_v9 = vsel %vm418_vm2, %v354_v47, %v483_v61  ;;  %v549_v10 = vsel %vm420_vm3, %v356_v48, %v485_v62  ;;  %vm422_vm6 = vcmp.ge.f32.partialorder %v358_v59, 0.0  ;;  %v375_v54 = vld [vmem:[%s2250_s29 + $0x1a8] sm:$0xff]  ;;  %v649_v60 = vld [vmem:[%s2854_s2 + $0x30] sm:$0xff] }
  0x98   : > { %v1672_v12 = vpack.c.bf16 %v549_v10, %v547_v9  ;;  %v488_v13 = vmul.f32 %v2258_v3, %v359_v52  ;;  %v490_v14 = vmul.f32 %v2258_v3, %v361_v56  ;;  %vm424_vm7 = vcmp.ge.f32.partialorder %v360_v63, 0.0  ;;  %702 = vperm.xlu1 %1818, %v648_v36   ;;  %v376_v2 = vld [vmem:[%s2250_s29 + $0x1b0] sm:$0xff]  ;;  %v381_v9 = vld [vmem:[%s2250_s29 + $0x1d8] sm:$0xff]  ;;  %707 = vperm.xlu0 %1817, %v649_v60   ;;  %v652_v10 = vld [vmem:[%s2854_s2 + $0x48] sm:$0xff] }
  0x99   : > { %v487_v16 = vmul.f32 %v2258_v3, %v358_v59  ;;  %v489_v17 = vmul.f32 %v2258_v3, %v360_v63  ;;  %vm427_vm8 = vcmp.ge.f32.partialorder %v363_v5, 0.0  ;;  %vm429_vm9 = vcmp.ge.f32.partialorder %v365_v6, 0.0  ;;  %v384_v36 = vld [vmem:[%s2250_s29 + $0x1f0] sm:$0xff]  ;;  %v614_v60 = vld [vmem:[#allocation3 + $0x118] sm:$0xff] }
  0x9a   : > { %1665 = vmatpush1.bf16.msra.mxu0 %v1664_v49  ;;  %1724 = vmatpush1.bf16.msra.mxu1 %v1664_v49  ;;  %v552_v19 = vsel %vm423_vm4, %v359_v52, %v488_v13  ;;  %v554_v20 = vsel %vm425_vm5, %v361_v56, %v490_v14  ;;  %v492_v21 = vmul.f32 %v2258_v3, %v363_v5  ;;  %vm426_vm10 = vcmp.ge.f32.partialorder %v362_v11, 0.0  ;;  %v650_v56 = vld [vmem:[%s2854_s2 + $0x38] sm:$0xff]  ;;  %v651_v14 = vld [vmem:[%s2854_s2 + $0x40] sm:$0xff] }
  0x9b   : > { %1667 = vmatprep.subr.bf16.mxu0 %v1666_v53  ;;  %1709 = vmatprep.subr.bf16.mxu1 %v1666_v53  ;;  %v1674_v25 = vpack.c.bf16 %v554_v20, %v552_v19  ;;  %v551_v26 = vsel %vm422_vm6, %v358_v59, %v487_v16  ;;  %v553_v27 = vsel %vm424_vm7, %v360_v63, %v489_v17  ;;  %vm428_vm11 = vcmp.ge.f32.partialorder %v364_v15, 0.0  ;;  %v374_v63 = vld [vmem:[%s2250_s29 + $0x1a0] sm:$0xff]  ;;  %v380_v19 = vld [vmem:[%s2250_s29 + $0x1d0] sm:$0xff] }
  0x9c   : > { %v1676_v29 = vpack.c.bf16 %v553_v27, %v551_v26  ;;  %v494_v30 = vmul.f32 %v2258_v3, %v365_v6  ;;  %v556_v31 = vsel %vm427_vm8, %v363_v5, %v492_v21  ;;  %v491_v32 = vmul.f32 %v2258_v3, %v362_v11  ;;  %712 = vperm.xlu1 %1818, %v650_v56   ;;  %v378_v17 = vld [vmem:[%s2250_s29 + $0x1c0] sm:$0xff]  ;;  %v662_v56 = vld [vmem:[%s2854_s2 + $0x98] sm:$0xff] }
  0x9d   : > { %v493_v34 = vmul.f32 %v2258_v3, %v364_v15  ;;  %vm431_vm12 = vcmp.ge.f32.partialorder %v367_v22, 0.0  ;;  %vm433_vm13 = vcmp.ge.f32.partialorder %v369_v23, 0.0  ;;  %v496_v35 = vmul.f32 %v2258_v3, %v367_v22  ;;  %717 = vperm.xlu0 %1817, %v651_v14   ;;  %v588_v14 = vld [vmem:[#allocation3 + $0x48] sm:$0xff] }
  0x9e   : > { %1669 = vmatpush1.bf16.msra.mxu0 %v1668_v1  ;;  %1725 = vmatpush1.bf16.msra.mxu1 %v1668_v1  ;;  %v558_v37 = vsel %vm429_vm9, %v365_v6, %v494_v30  ;;  %v555_v38 = vsel %vm426_vm10, %v362_v11, %v491_v32  ;;  %v498_v39 = vmul.f32 %v2258_v3, %v369_v23  ;;  %vm430_vm14 = vcmp.ge.f32.partialorder %v366_v28, 0.0  ;;  %v653_v30 = vld [vmem:[%s2854_s2 + $0x50] sm:$0xff] }
  0x9f   : > { %1671 = vmatprep.subr.bf16.mxu0 %v1670_v8  ;;  %1710 = vmatprep.subr.bf16.mxu1 %v1670_v8  ;;  %v1678_v43 = vpack.c.bf16 %v558_v37, %v556_v31  ;;  %v557_v44 = vsel %vm428_vm11, %v364_v15, %v493_v34  ;;  %v560_v45 = vsel %vm431_vm12, %v367_v22, %v496_v35  ;;  %vm432_vm15 = vcmp.ge.f32.partialorder %v368_v33, 0.0  ;;  %v379_v8 = vld [vmem:[%s2250_s29 + $0x1c8] sm:$0xff]  ;;  %v382_v35 = vld [vmem:[%s2250_s29 + $0x1e0] sm:$0xff] }
  0xa0   : > { %v1680_v46 = vpack.c.bf16 %v557_v44, %v555_v38  ;;  %v562_v47 = vsel %vm433_vm13, %v369_v23, %v498_v39  ;;  %v495_v48 = vmul.f32 %v2258_v3, %v366_v28  ;;  %v497_v49 = vmul.f32 %v2258_v3, %v368_v33  ;;  %722 = vperm.xlu1 %1818, %v652_v10   ;;  %v656_v38 = vld [vmem:[%s2854_s2 + $0x68] sm:$0xff]  ;;  %v665_v10 = vld [vmem:[%s2854_s2 + $0xb0] sm:$0xff] }
  0xa1   : > { %v1682_v52 = vpack.c.bf16 %v562_v47, %v560_v45  ;;  %vm435_vm0 = vcmp.ge.f32.partialorder %v371_v40, 0.0  ;;  %vm437_vm1 = vcmp.ge.f32.partialorder %v373_v41, 0.0  ;;  %v500_v53 = vmul.f32 %v2258_v3, %v371_v40  ;;  %727 = vperm.xlu0 %1817, %v653_v30   ;;  %v591_v30 = vld [vmem:[#allocation3 + $0x60] sm:$0xff] }
  0xa2   : > { %1673 = vmatpush1.bf16.msra.mxu0 %v1672_v12  ;;  %1726 = vmatpush1.bf16.msra.mxu1 %v1672_v12  ;;  %v559_v57 = vsel %vm430_vm14, %v366_v28, %v495_v48  ;;  %v561_v58 = vsel %vm432_vm15, %v368_v33, %v497_v49  ;;  %v502_v59 = vmul.f32 %v2258_v3, %v373_v41  ;;  %vm434_vm2 = vcmp.ge.f32.partialorder %v370_v50, 0.0  ;;  %v658_v48 = vld [vmem:[%s2854_s2 + $0x78] sm:$0xff] }
  0xa3   : > { %1675 = vmatprep.subr.bf16.mxu0 %v1674_v25  ;;  %1711 = vmatprep.subr.bf16.mxu1 %v1674_v25  ;;  %v564_v61 = vsel %vm435_vm0, %v371_v40, %v500_v53  ;;  %vm436_vm3 = vcmp.ge.f32.partialorder %v372_v51, 0.0  ;;  %v499_v62 = vmul.f32 %v2258_v3, %v370_v50  ;;  %v501_v1 = vmul.f32 %v2258_v3, %v372_v51  ;;  %v654_v25 = vld [vmem:[%s2854_s2 + $0x58] sm:$0xff]  ;;  %v660_v53 = vld [vmem:[%s2854_s2 + $0x88] sm:$0xff] }
  0xa4   : > { %v566_v0 = vsel %vm437_vm1, %v373_v41, %v502_v59  ;;  %vm439_vm4 = vcmp.ge.f32.partialorder %v375_v54, 0.0  ;;  %vm441_vm5 = vcmp.ge.f32.partialorder %v377_v55, 0.0  ;;  %v1684_v4 = vpack.c.bf16 %v561_v58, %v559_v57  ;;  %732 = vperm.xlu1 %1818, %v654_v25   ;;  %v579_v57 = vld [vmem:[#allocation3] sm:$0xff]  ;;  %v582_v59 = vld [vmem:[#allocation3 + $0x18] sm:$0xff]  ;;  %v621_v25 = vld [vmem:[#allocation3 + $0x150] sm:$0xff] }
  0xa5   : > { %v1686_v5 = vpack.c.bf16 %v566_v0, %v564_v61  ;;  %v504_v6 = vmul.f32 %v2258_v3, %v375_v54  ;;  %v506_v7 = vmul.f32 %v2258_v3, %v377_v55  ;;  %v563_v11 = vsel %vm434_vm2, %v370_v50, %v499_v62  ;;  %737 = vperm.xlu0 %1817, %v655_v42   ;;  %v657_v50 = vld [vmem:[%s2854_s2 + $0x70] sm:$0xff]  ;;  %v611_v58 = vld [vmem:[#allocation3 + $0x100] sm:$0xff]  ;;  %v664_v62 = vld [vmem:[%s2854_s2 + $0xa8] sm:$0xff] }
  0xa6   : > { %1677 = vmatpush1.bf16.msra.mxu0 %v1676_v29  ;;  %1727 = vmatpush1.bf16.msra.mxu1 %v1676_v29  ;;  %v565_v12 = vsel %vm436_vm3, %v372_v51, %v501_v1  ;;  %v503_v13 = vmul.f32 %v2258_v3, %v374_v63  ;;  %vm438_vm6 = vcmp.ge.f32.partialorder %v374_v63, 0.0  ;;  %vm440_vm7 = vcmp.ge.f32.partialorder %v376_v2, 0.0  ;;  %v385_v29 = vld [vmem:[%s2250_s29 + $0x1f8] sm:$0xff]  ;;  %v661_v61 = vld [vmem:[%s2854_s2 + $0x90] sm:$0xff]  ;;  %v584_v1 = vld [vmem:[#allocation3 + $0x28] sm:$0xff]  ;;  %s1907_s29 = scalar_lea.vmem %s2797_s16, 8192 }
  0xa7   : > { %1679 = vmatprep.subr.bf16.mxu0 %v1678_v43  ;;  %1712 = vmatprep.subr.bf16.mxu1 %v1678_v43  ;;  %v568_v15 = vsel %vm439_vm4, %v375_v54, %v504_v6  ;;  %v570_v16 = vsel %vm441_vm5, %v377_v55, %v506_v7  ;;  %v505_v18 = vmul.f32 %v2258_v3, %v376_v2  ;;  %vm443_vm8 = vcmp.ge.f32.partialorder %v379_v8, 0.0  ;;  %v659_v55 = vld [vmem:[%s2854_s2 + $0x80] sm:$0xff]  ;;  %v613_v0 = vld [vmem:[#allocation3 + $0x110] sm:$0xff]  ;;  %v630_v42 = vld [vmem:[#allocation3 + $0x198] sm:$0xff]  ;;  %p1908_p10 = scmp.ne.s32.totalorder %s2797_s16, %s1907_s29  ;;  %p1915_p3 = scmp.lt.s32.totalorder %s1913_s12, %s1907_s29 }
  0xa8   : > { %vm445_vm9 = vcmp.ge.f32.partialorder %v381_v9, 0.0  ;;  %v1688_v20 = vpack.c.bf16 %v565_v12, %v563_v11  ;;  %v1690_v21 = vpack.c.bf16 %v570_v16, %v568_v15  ;;  %v508_v22 = vmul.f32 %v2258_v3, %v379_v8  ;;  %742 = vperm.xlu1 %1818, %v656_v38   ;;  %v583_v6 = vld [vmem:[#allocation3 + $0x20] sm:$0xff]  ;;  %v668_v11 = vld [vmem:[%s2854_s2 + $0xc8] sm:$0xff]  ;;  %v585_v12 = vld [vmem:[#allocation3 + $0x30] sm:$0xff] }
  0xa9   : > { %v510_v23 = vmul.f32 %v2258_v3, %v381_v9  ;;  %v567_v26 = vsel %vm438_vm6, %v374_v63, %v503_v13  ;;  %v569_v27 = vsel %vm440_vm7, %v376_v2, %v505_v18  ;;  %v507_v28 = vmul.f32 %v2258_v3, %v378_v17  ;;  %747 = vperm.xlu0 %1817, %v657_v50   ;;  %v581_v63 = vld [vmem:[#allocation3 + $0x10] sm:$0xff]  ;;  %v616_v2 = vld [vmem:[#allocation3 + $0x128] sm:$0xff]  ;;  %v615_v7 = vld [vmem:[#allocation3 + $0x120] sm:$0xff]  ;;  %p1909_p12 = pnand %p1908_p10, %p2878_p2  ;;  %p1916_p5 = por %p1915_p3, %p1914_p4 }
  0xaa   : > { %1681 = vmatpush1.bf16.msra.mxu0 %v1680_v46  ;;  %1728 = vmatpush1.bf16.msra.mxu1 %v1680_v46  ;;  %v572_v31 = vsel %vm443_vm8, %v379_v8, %v508_v22  ;;  %vm442_vm10 = vcmp.ge.f32.partialorder %v378_v17, 0.0  ;;  %v509_v33 = vmul.f32 %v2258_v3, %v380_v19  ;;  %vm444_vm11 = vcmp.ge.f32.partialorder %v380_v19, 0.0  ;;  %v586_v8 = vld [vmem:[#allocation3 + $0x38] sm:$0xff]  ;;  %v617_v13 = vld [vmem:[#allocation3 + $0x130] sm:$0xff]  ;;  %v620_v15 = vld [vmem:[#allocation3 + $0x148] sm:$0xff] }
  0xab   : > { %1683 = vmatprep.subr.bf16.mxu0 %v1682_v52  ;;  %1713 = vmatprep.subr.bf16.mxu1 %v1682_v52  ;;  %v574_v32 = vsel %vm445_vm9, %v381_v9, %v510_v23  ;;  %v512_v34 = vmul.f32 %v2258_v3, %v383_v24  ;;  %vm447_vm12 = vcmp.ge.f32.partialorder %v383_v24, 0.0  ;;  %vm449_vm13 = vcmp.ge.f32.partialorder %v385_v29, 0.0  ;;  %v618_v9 = vld [vmem:[#allocation3 + $0x138] sm:$0xff]  ;;  %v667_v16 = vld [vmem:[%s2854_s2 + $0xc0] sm:$0xff]  ;;  %v669_v22 = vld [vmem:[%s2854_s2 + $0xd0] sm:$0xff]  ;;  %p1910_p0 = pneg %p1909_p12 }
  0xac   : > { %v514_v37 = vmul.f32 %v2258_v3, %v385_v29  ;;  %v1692_v39 = vpack.c.bf16 %v569_v27, %v567_v26  ;;  %v1694_v40 = vpack.c.bf16 %v574_v32, %v572_v31  ;;  %v571_v41 = vsel %vm442_vm10, %v378_v17, %v507_v28  ;;  %752 = vperm.xlu1 %1818, %v658_v48   ;;  %v670_v17 = vld [vmem:[%s2854_s2 + $0xd8] sm:$0xff]  ;;  %v587_v18 = vld [vmem:[#allocation3 + $0x40] sm:$0xff]  ;;  %v672_v23 = vld [vmem:[%s2854_s2 + $0xe8] sm:$0xff] }
  0xad   : > { %v573_v43 = vsel %vm444_vm11, %v380_v19, %v509_v33  ;;  %v511_v44 = vmul.f32 %v2258_v3, %v382_v35  ;;  %v513_v45 = vmul.f32 %v2258_v3, %v384_v36  ;;  %v576_v46 = vsel %vm447_vm12, %v383_v24, %v512_v34  ;;  %757 = vperm.xlu0 %1817, %v659_v55   ;;  %v619_v19 = vld [vmem:[#allocation3 + $0x140] sm:$0xff]  ;;  %v589_v24 = vld [vmem:[#allocation3 + $0x50] sm:$0xff]  ;;  %v592_v26 = vld [vmem:[#allocation3 + $0x68] sm:$0xff]  ;;  %p1917_p11 = pnand %p1916_p5, %p1910_p0 }
  0xae   : > { %1685 = vmatpush1.bf16.msra.mxu0 %v1684_v4  ;;  %1729 = vmatpush1.bf16.msra.mxu1 %v1684_v4  ;;  %v578_v47 = vsel %vm449_vm13, %v385_v29, %v514_v37  ;;  %vm446_vm14 = vcmp.ge.f32.partialorder %v382_v35, 0.0  ;;  %vm448_vm15 = vcmp.ge.f32.partialorder %v384_v36, 0.0  ;;  %v1696_v49 = vpack.c.bf16 %v573_v43, %v571_v41  ;;  %v663_v4 = vld [vmem:[%s2854_s2 + $0xa0] sm:$0xff]  ;;  %v624_v27 = vld [vmem:[#allocation3 + $0x168] sm:$0xff]  ;;  %v674_v29 = vld [vmem:[%s2854_s2 + $0xf8] sm:$0xff] }
  0xaf   : > { %1687 = vmatprep.subr.bf16.mxu0 %v1686_v5  ;;  %1714 = vmatprep.subr.bf16.mxu1 %v1686_v5  ;;  %v1698_v3 = vpack.c.bf16 %v578_v47, %v576_v46  ;;  %v575_v51 = vsel %vm446_vm14, %v382_v35, %v511_v44  ;;  %v577_v52 = vsel %vm448_vm15, %v384_v36, %v513_v45  ;;  %v666_v5 = vld [vmem:[%s2854_s2 + $0xb8] sm:$0xff]  ;;  %v671_v28 = vld [vmem:[%s2854_s2 + $0xe0] sm:$0xff]  ;;  %v673_v34 = vld [vmem:[%s2854_s2 + $0xf0] sm:$0xff] }
  0xb0   : > { %v1700_v54 = vpack.c.bf16 %v577_v52, %v575_v51  ;;  %762 = vperm.xlu1 %1818, %v660_v53   ;;  %v623_v31 = vld [vmem:[#allocation3 + $0x160] sm:$0xff]  ;;  %v594_v32 = vld [vmem:[#allocation3 + $0x78] sm:$0xff]  ;;  %v593_v35 = vld [vmem:[#allocation3 + $0x70] sm:$0xff] }
  0xb1   : > { %767 = vperm.xlu0 %1817, %v661_v61   ;;  %v626_v33 = vld [vmem:[#allocation3 + $0x178] sm:$0xff]  ;;  %v625_v36 = vld [vmem:[#allocation3 + $0x170] sm:$0xff]  ;;  %v596_v37 = vld [vmem:[#allocation3 + $0x88] sm:$0xff] }
  0xb2   : > { %1689 = vmatpush1.bf16.msra.mxu0 %v1688_v20  ;;  %1730 = vmatpush1.bf16.msra.mxu1 %v1688_v20  ;;  %v590_v20 = vld [vmem:[#allocation3 + $0x58] sm:$0xff]  ;;  %v628_v38 = vld [vmem:[#allocation3 + $0x188] sm:$0xff]  ;;  %v597_v43 = vld [vmem:[#allocation3 + $0x90] sm:$0xff] }
  0xb3   : > { %1691 = vmatprep.subr.bf16.mxu0 %v1690_v21  ;;  %1715 = vmatprep.subr.bf16.mxu1 %v1690_v21  ;;  %v622_v21 = vld [vmem:[#allocation3 + $0x158] sm:$0xff]  ;;  %v629_v44 = vld [vmem:[#allocation3 + $0x190] sm:$0xff]  ;;  %v600_v45 = vld [vmem:[#allocation3 + $0xa8] sm:$0xff] }
  0xb4   : > { %772 = vperm.xlu1 %1818, %v662_v56   ;;  %v598_v41 = vld [vmem:[#allocation3 + $0x98] sm:$0xff]  ;;  %v632_v46 = vld [vmem:[#allocation3 + $0x1a8] sm:$0xff]  ;;  %v599_v47 = vld [vmem:[#allocation3 + $0xa0] sm:$0xff] }
  0xb5   : > { %777 = vperm.xlu0 %1817, %v663_v4   ;;  %v631_v48 = vld [vmem:[#allocation3 + $0x1a0] sm:$0xff]  ;;  %v634_v50 = vld [vmem:[#allocation3 + $0x1b8] sm:$0xff]  ;;  %v633_v51 = vld [vmem:[#allocation3 + $0x1b0] sm:$0xff] }
  0xb6   : > { %1693 = vmatpush1.bf16.msra.mxu0 %v1692_v39  ;;  %1731 = vmatpush1.bf16.msra.mxu1 %v1692_v39  ;;  %v595_v39 = vld [vmem:[#allocation3 + $0x80] sm:$0xff]  ;;  %v604_v52 = vld [vmem:[#allocation3 + $0xc8] sm:$0xff]  ;;  %v606_v56 = vld [vmem:[#allocation3 + $0xd8] sm:$0xff] }
  0xb7   : > { %1695 = vmatprep.subr.bf16.mxu0 %v1694_v40  ;;  %1716 = vmatprep.subr.bf16.mxu1 %v1694_v40  ;;  %v627_v40 = vld [vmem:[#allocation3 + $0x180] sm:$0xff]  ;;  %v636_v53 = vld [vmem:[#allocation3 + $0x1c8] sm:$0xff]  ;;  %v641_v4 = vld [vmem:[#allocation3 + $0x1f0] sm:$0xff] }
  0xb8   : > { %782 = vperm.xlu1 %1818, %v664_v62   ;;  %v635_v55 = vld [vmem:[#allocation3 + $0x1c0] sm:$0xff]  ;;  %v640_v61 = vld [vmem:[#allocation3 + $0x1e8] sm:$0xff] }
  0xb9   : > { %787 = vperm.xlu0 %1817, %v665_v10   ;;  %v607_v62 = vld [vmem:[#allocation3 + $0xe0] sm:$0xff] }
  0xba   : > { %1697 = vmatpush1.bf16.msra.mxu0 %v1696_v49  ;;  %1732 = vmatpush1.bf16.msra.mxu1 %v1696_v49  ;;  %v602_v49 = vld [vmem:[#allocation3 + $0xb8] sm:$0xff] }
  0xbb   : > { %1699 = vmatprep.subr.bf16.mxu0 %v1698_v3  ;;  %1717 = vmatprep.subr.bf16.mxu1 %v1698_v3  ;;  %v601_v3 = vld [vmem:[#allocation3 + $0xb0] sm:$0xff] }
  0xbc   : > { %792 = vperm.xlu1 %1818, %v666_v5  }
  0xbd   : > { %797 = vperm.xlu0 %1817, %v667_v16  }
  0xbe   : > { %1701 = vmatpush1.bf16.msra.mxu0 %v1700_v54  ;;  %1733 = vmatpush1.bf16.msra.mxu1 %v1700_v54  ;;  %v603_v54 = vld [vmem:[#allocation3 + $0xc0] sm:$0xff] }
  0xc0   : > { %802 = vperm.xlu1 %1818, %v668_v11  }
  0xc1   : > { %900 = vmatmul.mubr.f32.vlgmr.msra.gmra.mrb[0].mxu0 %v579_v57  ;;  %996 = vmatmul.mubr.f32.vlgmr.msra.gmra.mrb[0].mxu1 %v611_v58  ;;  %v638_v57 = vld [vmem:[#allocation3 + $0x1d8] sm:$0xff]  ;;  %v605_v58 = vld [vmem:[#allocation3 + $0xd0] sm:$0xff] }
  0xc2   : > { %905 = vmatprep.mubr.f32.mxu0 %v582_v59  ;;  %1001 = vmatprep.mubr.f32.mxu1 %v614_v60  ;;  %v637_v59 = vld [vmem:[#allocation3 + $0x1d0] sm:$0xff]  ;;  %v608_v60 = vld [vmem:[#allocation3 + $0xe8] sm:$0xff] }
  0xc3   : > { %807 = vperm.xlu0 %1817, %v669_v22  }
  0xc4   : > { %812 = vperm.xlu1 %1818, %v670_v17  }
  0xc5   : > { %906 = vmatmul.mubr.f32.gmra.mrb[2].mxu0 %v581_v63  ;;  %1002 = vmatmul.mubr.f32.gmra.mrb[2].mxu1 %v613_v0  ;;  %v639_v63 = vld [vmem:[#allocation3 + $0x1e0] sm:$0xff]  ;;  %v610_v0 = vld [vmem:[#allocation3 + $0xf8] sm:$0xff] }
  0xc6   : > { %911 = vmatprep.mubr.f32.mxu0 %v584_v1  ;;  %1007 = vmatprep.mubr.f32.mxu1 %v616_v2  ;;  %v642_v1 = vld [vmem:[#allocation3 + $0x1f8] sm:$0xff]  ;;  %v609_v2 = vld [vmem:[#allocation3 + $0xf0] sm:$0xff] }
  0xc7   : > { %817 = vperm.xlu0 %1817, %v671_v28   ;;  %v1156_v28 = vld [vmem:[%s2561_s28] sm:$0xff] }
  0xc8   : > { %822 = vperm.xlu1 %1818, %v672_v23  }
  0xc9   : > { %912 = vmatmul.mubr.f32.gmra.mrb[4].mxu0 %v583_v6  ;;  %1008 = vmatmul.mubr.f32.gmra.mrb[4].mxu1 %v615_v7 }
  0xca   : > { %917 = vmatprep.mubr.f32.mxu0 %v586_v8  ;;  %1013 = vmatprep.mubr.f32.mxu1 %v618_v9 }
  0xcb   : > { %827 = vperm.xlu0 %1817, %v673_v34   ;;  %v1157_v34 = vld [vmem:[%s2561_s28 + $0x8] sm:$0xff] }
  0xcc   : > { %832 = vperm.xlu1 %1818, %v674_v29   ;;  %v1188_v29 = vld [vmem:[%s2561_s28 + $0x100] sm:$0xff] }
  0xcd   : > { %918 = vmatmul.mubr.f32.gmra.mrb[6].mxu0 %v585_v12  ;;  %1014 = vmatmul.mubr.f32.gmra.mrb[6].mxu1 %v617_v13 }
  0xce   : > { %923 = vmatprep.mubr.f32.mxu0 %v588_v14  ;;  %1019 = vmatprep.mubr.f32.mxu1 %v620_v15 }
  0xd1   : > { %924 = vmatmul.mubr.f32.gmra.mrb[8].mxu0 %v587_v18  ;;  %1020 = vmatmul.mubr.f32.gmra.mrb[8].mxu1 %v619_v19 }
  0xd2   : > { %929 = vmatprep.mubr.f32.mxu0 %v590_v20  ;;  %1025 = vmatprep.mubr.f32.mxu1 %v622_v21 }
  0xd5   : > { %930 = vmatmul.mubr.f32.gmra.mrb[10].mxu0 %v589_v24  ;;  %1026 = vmatmul.mubr.f32.gmra.mrb[10].mxu1 %v621_v25 }
  0xd6   : > { %935 = vmatprep.mubr.f32.mxu0 %v592_v26  ;;  %1031 = vmatprep.mubr.f32.mxu1 %v624_v27 }
  0xd9   : > { %936 = vmatmul.mubr.f32.gmra.mrb[12].mxu0 %v591_v30  ;;  %1032 = vmatmul.mubr.f32.gmra.mrb[12].mxu1 %v623_v31 }
  0xda   : > { %941 = vmatprep.mubr.f32.mxu0 %v594_v32  ;;  %1037 = vmatprep.mubr.f32.mxu1 %v626_v33 }
  0xdd   : > { %942 = vmatmul.mubr.f32.gmra.mrb[14].mxu0 %v593_v35  ;;  %1038 = vmatmul.mubr.f32.gmra.mrb[14].mxu1 %v625_v36  ;;  %v1189_v35 = vld [vmem:[%s2561_s28 + $0x108] sm:$0xff] }
  0xde   : > { %947 = vmatprep.mubr.f32.mxu0 %v596_v37  ;;  %1043 = vmatprep.mubr.f32.mxu1 %v628_v38 }
  0xe1   : > { %948 = vmatmul.mubr.f32.gmra.mrb[16].mxu0 %v595_v39  ;;  %1044 = vmatmul.mubr.f32.gmra.mrb[16].mxu1 %v627_v40 }
  0xe2   : > { %953 = vmatprep.mubr.f32.mxu0 %v598_v41  ;;  %1049 = vmatprep.mubr.f32.mxu1 %v630_v42 }
  0xe5   : > { %954 = vmatmul.mubr.f32.gmra.mrb[18].mxu0 %v597_v43  ;;  %1050 = vmatmul.mubr.f32.gmra.mrb[18].mxu1 %v629_v44 }
  0xe6   : > { %959 = vmatprep.mubr.f32.mxu0 %v600_v45  ;;  %1055 = vmatprep.mubr.f32.mxu1 %v632_v46 }
  0xe9   : > { %960 = vmatmul.mubr.f32.gmra.mrb[20].mxu0 %v599_v47  ;;  %1056 = vmatmul.mubr.f32.gmra.mrb[20].mxu1 %v631_v48 }
  0xea   : > { %965 = vmatprep.mubr.f32.mxu0 %v602_v49  ;;  %1061 = vmatprep.mubr.f32.mxu1 %v634_v50 }
  0xed   : > { %966 = vmatmul.mubr.f32.gmra.mrb[22].mxu0 %v601_v3  ;;  %1062 = vmatmul.mubr.f32.gmra.mrb[22].mxu1 %v633_v51 }
  0xee   : > { %971 = vmatprep.mubr.f32.mxu0 %v604_v52  ;;  %1067 = vmatprep.mubr.f32.mxu1 %v636_v53 }
  0xf1   : > { %972 = vmatmul.mubr.f32.gmra.mrb[24].mxu0 %v603_v54  ;;  %1068 = vmatmul.mubr.f32.gmra.mrb[24].mxu1 %v635_v55 }
  0xf2   : > { %977 = vmatprep.mubr.f32.mxu0 %v606_v56  ;;  %1073 = vmatprep.mubr.f32.mxu1 %v638_v57  ;;  %v1158_v57 = vld [vmem:[%s2561_s28 + $0x10] sm:$0xff] }
  0xf5   : > { %978 = vmatmul.mubr.f32.gmra.mrb[26].mxu0 %v605_v58  ;;  %1074 = vmatmul.mubr.f32.gmra.mrb[26].mxu1 %v637_v59  ;;  %v1190_v58 = vld [vmem:[%s2561_s28 + $0x110] sm:$0xff] }
  0xf6   : > { %983 = vmatprep.mubr.f32.mxu0 %v608_v60  ;;  %1079 = vmatprep.mubr.f32.mxu1 %v640_v61 }
  0xf9   : > { %984 = vmatmul.mubr.f32.gmra.mrb[28].mxu0 %v607_v62  ;;  %1080 = vmatmul.mubr.f32.gmra.mrb[28].mxu1 %v639_v63 }
  0xfa   : > { %989 = vmatprep.mubr.f32.mxu0 %v610_v0  ;;  %1085 = vmatprep.mubr.f32.mxu1 %v642_v1  ;;  %v1159_v1 = vld [vmem:[%s2561_s28 + $0x18] sm:$0xff] }
  0xfd   : > { %990 = vmatmul.mubr.f32.gmra.mrb[30].mxu0 %v609_v2  ;;  %1086 = vmatmul.mubr.f32.gmra.mrb[30].mxu1 %v641_v4  ;;  %v1191_v2 = vld [vmem:[%s2561_s28 + $0x118] sm:$0xff] }
 0x10b   : > { %v678_v5 = vpop.permute.xlu0 %677  ;;  %v2532_v6 = vpop.permute.xlu1 %687 }
 0x10f   : > { %v683_v7 = vpop.permute.xlu0 %682  ;;  %v2534_v8 = vpop.permute.xlu1 %692 }
 0x113   : > { %v2536_v9 = vpop.permute.xlu0 %697 }
 0x117   : > { %v2538_v10 = vpop.permute.xlu1 %702  ;;  %v2540_v11 = vpop.permute.xlu0 %707 }
 0x11b   : > { %v2542_v12 = vpop.permute.xlu1 %712 }
 0x11c   : > { %v2544_v13 = vpop.permute.xlu0 %717 }
 0x11f   : > { %v2546_v14 = vpop.permute.xlu1 %722 }
 0x120   : > { %v2548_v15 = vpop.permute.xlu0 %727 }
 0x123   : > { %v2550_v16 = vpop.permute.xlu1 %732 }
 0x124   : > { %v2552_v17 = vpop.permute.xlu0 %737 }
 0x127   : > { %v2554_v18 = vpop.permute.xlu1 %742 }
 0x128   : > { %v2556_v19 = vpop.permute.xlu0 %747 }
 0x12b   : > { %v2558_v20 = vpop.permute.xlu1 %752 }
 0x12c   : > { %v758_v21 = vpop.permute.xlu0 %757 }
 0x12f   : > { %v763_v46 = vpop.permute.xlu1 %762 }
 0x130   : > { %v768_v3 = vpop.permute.xlu0 %767 }
 0x194   : > { %v901_v22 = vpop.f32.mrb[0].mxu0  ;;  %v997_v23 = vpop.f32.mrb[0].mxu1 }
 0x195   : > { %v902_v24 = vadd.f32 %v901_v22, %v678_v5  ;;  %v998_v25 = vadd.f32 %v997_v23, %v758_v21  ;;  %v903_v26 = vpop.f32.mrb[1].mxu0  ;;  %v999_v27 = vpop.f32.mrb[1].mxu1 }
 0x196   : > { %v904_v30 = vadd.f32 %v903_v26, %v678_v5  ;;  %v1000_v31 = vadd.f32 %v999_v27, %v758_v21 }
 0x197   : > { %v1092_v32 = vmax.f32 %v902_v24, 0.0  ;;  %v1124_v33 = vmax.f32 %v998_v25, 0.0 }
 0x198   : > { %v1093_v36 = vmax.f32 %v904_v30, 0.0  ;;  %v1125_v37 = vmax.f32 %v1000_v31, 0.0  ;;  %v907_v38 = vpop.f32.mrb[2].mxu0  ;;  %v1003_v39 = vpop.f32.mrb[2].mxu1 }
 0x199   : > { %v1220_v40 = vmul.f32 %v1156_v28, %v1092_v32  ;;  %v1348_v41 = vmul.f32 %v1188_v29, %v1092_v32  ;;  %v1252_v42 = vmul.f32 %v1188_v29, %v1124_v33  ;;  %v1380_v43 = vmul.f32 %v1156_v28, %v1124_v33  ;;  %v909_v44 = vpop.f32.mrb[3].mxu0  ;;  %v1005_v45 = vpop.f32.mrb[3].mxu1 }
 0x19a   : > { %v1221_v47 = vmul.f32 %v1157_v34, %v1093_v36  ;;  %v1349_v48 = vmul.f32 %v1189_v35, %v1093_v36  ;;  %v1253_v49 = vmul.f32 %v1189_v35, %v1125_v37  ;;  %v1381_v50 = vmul.f32 %v1157_v34, %v1125_v37  ;;  %v1160_v34 = vld [vmem:[%s2561_s28 + $0x20] sm:$0xff] }
 0x19b   : > { %v1284_v51 = vsub.f32 %v1220_v40, %v1252_v42  ;;  %v1412_v52 = vadd.f32 %v1380_v43, %v1348_v41  ;;  %v908_v53 = vadd.f32 %v907_v38, %v683_v7  ;;  %v1004_v54 = vadd.f32 %v1003_v39, %v763_v46  ;;  %v1192_v35 = vld [vmem:[%s2561_s28 + $0x120] sm:$0xff]  ;;  %v1161_v41 = vld [vmem:[%s2561_s28 + $0x28] sm:$0xff] }
 0x19c   : > { %v1285_v55 = vsub.f32 %v1221_v47, %v1253_v49  ;;  %v1413_v56 = vadd.f32 %v1381_v50, %v1349_v48  ;;  %v910_v59 = vadd.f32 %v909_v44, %v683_v7  ;;  %v1006_v60 = vadd.f32 %v1005_v45, %v763_v46  ;;  %v913_v61 = vpop.f32.mrb[4].mxu0  ;;  %v1009_v62 = vpop.f32.mrb[4].mxu1  ;;  %v1193_v42 = vld [vmem:[%s2561_s28 + $0x128] sm:$0xff] }
 0x19d   : > { %1316 = vst [vmem:[%s2570_s19] sm:$0xff] %v1284_v51  ;;  %1444 = vst [vmem:[%s2570_s19 + $0x100] sm:$0xff] %v1412_v52  ;;  %v1094_v63 = vmax.f32 %v908_v53, 0.0  ;;  %v1126_v0 = vmax.f32 %v1004_v54, 0.0  ;;  %v914_v4 = vadd.f32 %v913_v61, %v2532_v6  ;;  %v1010_v5 = vadd.f32 %v1009_v62, %v768_v3  ;;  %v915_v21 = vpop.f32.mrb[5].mxu0  ;;  %v1011_v7 = vpop.f32.mrb[5].mxu1 }
 0x19e   : > { %1317 = vst [vmem:[%s2570_s19 + $0x8] sm:$0xff] %v1285_v55  ;;  %1445 = vst [vmem:[%s2570_s19 + $0x108] sm:$0xff] %v1413_v56  ;;  %v1095_v22 = vmax.f32 %v910_v59, 0.0  ;;  %v1127_v23 = vmax.f32 %v1006_v60, 0.0  ;;  %v916_v24 = vadd.f32 %v915_v21, %v2532_v6  ;;  %v1012_v25 = vadd.f32 %v1011_v7, %v768_v3  ;;  %v773_v49 = vpop.permute.xlu1 %772  ;;  %v1194_v21 = vld [vmem:[%s2561_s28 + $0x130] sm:$0xff] }
 0x19f   : > { %v1222_v26 = vmul.f32 %v1158_v57, %v1094_v63  ;;  %v1350_v27 = vmul.f32 %v1190_v58, %v1094_v63  ;;  %v1254_v28 = vmul.f32 %v1190_v58, %v1126_v0  ;;  %v1382_v29 = vmul.f32 %v1158_v57, %v1126_v0 }
 0x1a0   : > { %v1223_v30 = vmul.f32 %v1159_v1, %v1095_v22  ;;  %v1351_v31 = vmul.f32 %v1191_v2, %v1095_v22  ;;  %v1255_v32 = vmul.f32 %v1191_v2, %v1127_v23  ;;  %v1383_v33 = vmul.f32 %v1159_v1, %v1127_v23  ;;  %v919_v36 = vpop.f32.mrb[6].mxu0  ;;  %v1015_v37 = vpop.f32.mrb[6].mxu1 }
 0x1a1   : > { %v1286_v38 = vsub.f32 %v1222_v26, %v1254_v28  ;;  %v1414_v39 = vadd.f32 %v1382_v29, %v1350_v27  ;;  %v1096_v6 = vmax.f32 %v914_v4, 0.0  ;;  %v1128_v40 = vmax.f32 %v1010_v5, 0.0  ;;  %v921_v43 = vpop.f32.mrb[7].mxu0  ;;  %v1017_v44 = vpop.f32.mrb[7].mxu1  ;;  %v1162_v5 = vld [vmem:[%s2561_s28 + $0x30] sm:$0xff]  ;;  %v1195_v26 = vld [vmem:[%s2561_s28 + $0x138] sm:$0xff] }
 0x1a2   : > { %v1287_v45 = vsub.f32 %v1223_v30, %v1255_v32  ;;  %v1415_v46 = vadd.f32 %v1383_v33, %v1351_v31  ;;  %v1097_v47 = vmax.f32 %v916_v24, 0.0  ;;  %v1129_v48 = vmax.f32 %v1012_v25, 0.0  ;;  %v778_v1 = vpop.permute.xlu0 %777  ;;  %v1163_v25 = vld [vmem:[%s2561_s28 + $0x38] sm:$0xff] }
 0x1a3   : > { %1318 = vst [vmem:[%s2570_s19 + $0x10] sm:$0xff] %v1286_v38  ;;  %1446 = vst [vmem:[%s2570_s19 + $0x110] sm:$0xff] %v1414_v39  ;;  %v1224_v50 = vmul.f32 %v1160_v34, %v1096_v6  ;;  %v1352_v3 = vmul.f32 %v1192_v35, %v1096_v6  ;;  %v1256_v51 = vmul.f32 %v1192_v35, %v1128_v40 }
 0x1a4   : > { %v1384_v52 = vmul.f32 %v1160_v34, %v1128_v40  ;;  %1319 = vst [vmem:[%s2570_s19 + $0x18] sm:$0xff] %v1287_v45  ;;  %1447 = vst [vmem:[%s2570_s19 + $0x118] sm:$0xff] %v1415_v46  ;;  %v1225_v53 = vmul.f32 %v1161_v41, %v1097_v47  ;;  %v1353_v54 = vmul.f32 %v1193_v42, %v1097_v47  ;;  %v925_v57 = vpop.f32.mrb[8].mxu0  ;;  %v1021_v58 = vpop.f32.mrb[8].mxu1 }
 0x1a5   : > { %v1257_v55 = vmul.f32 %v1193_v42, %v1129_v48  ;;  %v1385_v56 = vmul.f32 %v1161_v41, %v1129_v48  ;;  %v1288_v59 = vsub.f32 %v1224_v50, %v1256_v51  ;;  %v920_v61 = vadd.f32 %v919_v36, %v2534_v8  ;;  %v927_v63 = vpop.f32.mrb[9].mxu0  ;;  %v1023_v0 = vpop.f32.mrb[9].mxu1  ;;  %v1165_v48 = vld [vmem:[%s2561_s28 + $0x48] sm:$0xff] }
 0x1a6   : > { %v1416_v60 = vadd.f32 %v1384_v52, %v1352_v3  ;;  %v1016_v62 = vadd.f32 %v1015_v37, %v773_v49  ;;  %v922_v7 = vadd.f32 %v921_v43, %v2534_v8  ;;  %v1018_v22 = vadd.f32 %v1017_v44, %v773_v49  ;;  %v1164_v43 = vld [vmem:[%s2561_s28 + $0x40] sm:$0xff]  ;;  %v1197_v49 = vld [vmem:[%s2561_s28 + $0x148] sm:$0xff] }
 0x1a7   : > { %v1289_v2 = vsub.f32 %v1225_v53, %v1257_v55  ;;  %v1417_v4 = vadd.f32 %v1385_v56, %v1353_v54  ;;  %1320 = vst [vmem:[%s2570_s19 + $0x20] sm:$0xff] %v1288_v59  ;;  %v1098_v23 = vmax.f32 %v920_v61, 0.0  ;;  %v926_v27 = vadd.f32 %v925_v57, %v2536_v9  ;;  %v1196_v44 = vld [vmem:[%s2561_s28 + $0x140] sm:$0xff]  ;;  %v783_v61 = vpop.permute.xlu1 %782 }
 0x1a8   : > { %1448 = vst [vmem:[%s2570_s19 + $0x120] sm:$0xff] %v1416_v60  ;;  %v1130_v24 = vmax.f32 %v1016_v62, 0.0  ;;  %v1022_v28 = vadd.f32 %v1021_v58, %v778_v1  ;;  %v1099_v29 = vmax.f32 %v922_v7, 0.0  ;;  %v1131_v30 = vmax.f32 %v1018_v22, 0.0  ;;  %v931_v8 = vpop.f32.mrb[10].mxu0  ;;  %v1027_v33 = vpop.f32.mrb[10].mxu1 }
 0x1a9   : > { %1321 = vst [vmem:[%s2570_s19 + $0x28] sm:$0xff] %v1289_v2  ;;  %1449 = vst [vmem:[%s2570_s19 + $0x128] sm:$0xff] %v1417_v4  ;;  %v928_v31 = vadd.f32 %v927_v63, %v2536_v9  ;;  %v1024_v32 = vadd.f32 %v1023_v0, %v778_v1  ;;  %v1226_v34 = vmul.f32 %v1162_v5, %v1098_v23  ;;  %v933_v38 = vpop.f32.mrb[11].mxu0  ;;  %v1029_v39 = vpop.f32.mrb[11].mxu1  ;;  %v1100_v46 = vmax.f32 %v926_v27, 0.0 }
 0x1aa   : > { %v1354_v35 = vmul.f32 %v1194_v21, %v1098_v23  ;;  %v1258_v36 = vmul.f32 %v1194_v21, %v1130_v24  ;;  %v1386_v37 = vmul.f32 %v1162_v5, %v1130_v24  ;;  %v1227_v6 = vmul.f32 %v1163_v25, %v1099_v29  ;;  %v788_v2 = vpop.permute.xlu0 %787  ;;  %v1166_v24 = vld [vmem:[%s2561_s28 + $0x50] sm:$0xff] }
 0x1ab   : > { %v1355_v40 = vmul.f32 %v1195_v26, %v1099_v29  ;;  %v1259_v41 = vmul.f32 %v1195_v26, %v1131_v30  ;;  %v1387_v42 = vmul.f32 %v1163_v25, %v1131_v30  ;;  %v1132_v47 = vmax.f32 %v1022_v28, 0.0  ;;  %v1198_v25 = vld [vmem:[%s2561_s28 + $0x150] sm:$0xff] }
 0x1ac   : > { %v1290_v9 = vsub.f32 %v1226_v34, %v1258_v36  ;;  %v1418_v45 = vadd.f32 %v1386_v37, %v1354_v35  ;;  %v1101_v51 = vmax.f32 %v928_v31, 0.0  ;;  %v1133_v52 = vmax.f32 %v1024_v32, 0.0  ;;  %v937_v53 = vpop.f32.mrb[12].mxu0  ;;  %v1033_v54 = vpop.f32.mrb[12].mxu1  ;;  %v1167_v32 = vld [vmem:[%s2561_s28 + $0x58] sm:$0xff] }
 0x1ad   : > { %v1291_v50 = vsub.f32 %v1227_v6, %v1259_v41  ;;  %v1419_v3 = vadd.f32 %v1387_v42, %v1355_v40  ;;  %v1228_v55 = vmul.f32 %v1164_v43, %v1100_v46  ;;  %v1356_v56 = vmul.f32 %v1196_v44, %v1100_v46  ;;  %v939_v59 = vpop.f32.mrb[13].mxu0  ;;  %v1035_v60 = vpop.f32.mrb[13].mxu1  ;;  %v1199_v34 = vld [vmem:[%s2561_s28 + $0x158] sm:$0xff]  ;;  %v1168_v46 = vld [vmem:[%s2561_s28 + $0x60] sm:$0xff] }
 0x1ae   : > { %1322 = vst [vmem:[%s2570_s19 + $0x30] sm:$0xff] %v1290_v9  ;;  %1450 = vst [vmem:[%s2570_s19 + $0x130] sm:$0xff] %v1418_v45  ;;  %v1260_v57 = vmul.f32 %v1196_v44, %v1132_v47  ;;  %v1388_v58 = vmul.f32 %v1164_v43, %v1132_v47  ;;  %v1229_v62 = vmul.f32 %v1165_v48, %v1101_v51  ;;  %v1200_v47 = vld [vmem:[%s2561_s28 + $0x160] sm:$0xff] }
 0x1af   : > { %1323 = vst [vmem:[%s2570_s19 + $0x38] sm:$0xff] %v1291_v50  ;;  %1451 = vst [vmem:[%s2570_s19 + $0x138] sm:$0xff] %v1419_v3  ;;  %v1357_v63 = vmul.f32 %v1197_v49, %v1101_v51  ;;  %v1261_v0 = vmul.f32 %v1197_v49, %v1133_v52  ;;  %v1389_v1 = vmul.f32 %v1165_v48, %v1133_v52  ;;  %v1169_v52 = vld [vmem:[%s2561_s28 + $0x68] sm:$0xff] }
 0x1b0   : > { %v1292_v4 = vsub.f32 %v1228_v55, %v1260_v57  ;;  %v1420_v5 = vadd.f32 %v1388_v58, %v1356_v56  ;;  %v932_v21 = vadd.f32 %v931_v8, %v2538_v10  ;;  %v1028_v7 = vadd.f32 %v1027_v33, %v783_v61  ;;  %v943_v28 = vpop.f32.mrb[14].mxu0  ;;  %v1039_v29 = vpop.f32.mrb[14].mxu1 }
 0x1b1   : > { %v1293_v22 = vsub.f32 %v1229_v62, %v1261_v0  ;;  %v1421_v23 = vadd.f32 %v1389_v1, %v1357_v63  ;;  %v934_v26 = vadd.f32 %v933_v38, %v2538_v10  ;;  %v1030_v27 = vadd.f32 %v1029_v39, %v783_v61  ;;  %v945_v35 = vpop.f32.mrb[15].mxu0  ;;  %v1041_v36 = vpop.f32.mrb[15].mxu1 }
 0x1b2   : > { %1324 = vst [vmem:[%s2570_s19 + $0x40] sm:$0xff] %v1292_v4  ;;  %1452 = vst [vmem:[%s2570_s19 + $0x140] sm:$0xff] %v1420_v5  ;;  %v1102_v30 = vmax.f32 %v932_v21, 0.0  ;;  %v1134_v31 = vmax.f32 %v1028_v7, 0.0  ;;  %v938_v8 = vadd.f32 %v937_v53, %v2540_v11  ;;  %v1034_v33 = vadd.f32 %v1033_v54, %v788_v2  ;;  %v1201_v53 = vld [vmem:[%s2561_s28 + $0x168] sm:$0xff] }
 0x1b3   : > { %1325 = vst [vmem:[%s2570_s19 + $0x48] sm:$0xff] %v1293_v22  ;;  %1453 = vst [vmem:[%s2570_s19 + $0x148] sm:$0xff] %v1421_v23  ;;  %v1103_v37 = vmax.f32 %v934_v26, 0.0  ;;  %v1135_v10 = vmax.f32 %v1030_v27, 0.0  ;;  %v940_v38 = vadd.f32 %v939_v59, %v2540_v11  ;;  %v1036_v39 = vadd.f32 %v1035_v60, %v788_v2  ;;  %v793_v60 = vpop.permute.xlu1 %792 }
 0x1b4   : > { %v1230_v6 = vmul.f32 %v1166_v24, %v1102_v30  ;;  %v1358_v40 = vmul.f32 %v1198_v25, %v1102_v30  ;;  %v1262_v41 = vmul.f32 %v1198_v25, %v1134_v31  ;;  %v1390_v42 = vmul.f32 %v1166_v24, %v1134_v31  ;;  %v949_v48 = vpop.f32.mrb[16].mxu0  ;;  %v1045_v49 = vpop.f32.mrb[16].mxu1 }
 0x1b5   : > { %v1231_v43 = vmul.f32 %v1167_v32, %v1103_v37  ;;  %v1359_v44 = vmul.f32 %v1199_v34, %v1103_v37  ;;  %v1263_v9 = vmul.f32 %v1199_v34, %v1135_v10  ;;  %v1391_v45 = vmul.f32 %v1167_v32, %v1135_v10  ;;  %v951_v54 = vpop.f32.mrb[17].mxu0  ;;  %v1047_v55 = vpop.f32.mrb[17].mxu1  ;;  %v1170_v34 = vld [vmem:[%s2561_s28 + $0x70] sm:$0xff] }
 0x1b6   : > { %v1294_v50 = vsub.f32 %v1230_v6, %v1262_v41  ;;  %v1422_v3 = vadd.f32 %v1390_v42, %v1358_v40  ;;  %v1104_v11 = vmax.f32 %v938_v8, 0.0  ;;  %v1136_v51 = vmax.f32 %v1034_v33, 0.0  ;;  %v798_v30 = vpop.permute.xlu0 %797  ;;  %v1202_v8 = vld [vmem:[%s2561_s28 + $0x170] sm:$0xff] }
 0x1b7   : > { %v1295_v56 = vsub.f32 %v1231_v43, %v1263_v9  ;;  %v1423_v57 = vadd.f32 %v1391_v45, %v1359_v44  ;;  %v1105_v58 = vmax.f32 %v940_v38, 0.0  ;;  %v1137_v59 = vmax.f32 %v1036_v39, 0.0  ;;  %v1171_v38 = vld [vmem:[%s2561_s28 + $0x78] sm:$0xff] }
 0x1b8   : > { %1326 = vst [vmem:[%s2570_s19 + $0x50] sm:$0xff] %v1294_v50  ;;  %1454 = vst [vmem:[%s2570_s19 + $0x150] sm:$0xff] %v1422_v3  ;;  %v1232_v61 = vmul.f32 %v1168_v46, %v1104_v11  ;;  %v1360_v62 = vmul.f32 %v1200_v47, %v1104_v11  ;;  %v1264_v63 = vmul.f32 %v1200_v47, %v1136_v51  ;;  %v2628_v21 = vpop.f32.mrb[18].mxu0  ;;  %v2630_v7 = vpop.f32.mrb[18].mxu1  ;;  %v1172_v11 = vld [vmem:[%s2561_s28 + $0x80] sm:$0xff] }
 0x1b9   : > { %v1392_v0 = vmul.f32 %v1168_v46, %v1136_v51  ;;  %1327 = vst [vmem:[%s2570_s19 + $0x58] sm:$0xff] %v1295_v56  ;;  %1455 = vst [vmem:[%s2570_s19 + $0x158] sm:$0xff] %v1423_v57  ;;  %v1233_v1 = vmul.f32 %v1169_v52, %v1105_v58  ;;  %v1361_v2 = vmul.f32 %v1201_v53, %v1105_v58  ;;  %v2633_v26 = vpop.f32.mrb[19].mxu0  ;;  %v2635_v27 = vpop.f32.mrb[19].mxu1  ;;  %v1204_v51 = vld [vmem:[%s2561_s28 + $0x180] sm:$0xff]  ;;  %v1205_v56 = vld [vmem:[%s2561_s28 + $0x188] sm:$0xff] }
 0x1ba   : > { %v1265_v4 = vmul.f32 %v1201_v53, %v1137_v59  ;;  %v1393_v5 = vmul.f32 %v1169_v52, %v1137_v59  ;;  %v1296_v22 = vsub.f32 %v1232_v61, %v1264_v63  ;;  %v944_v24 = vadd.f32 %v943_v28, %v2542_v12 }
 0x1bb   : > { %v1424_v23 = vadd.f32 %v1392_v0, %v1360_v62  ;;  %v1040_v25 = vadd.f32 %v1039_v29, %v793_v60  ;;  %v946_v33 = vadd.f32 %v945_v35, %v2542_v12  ;;  %v1042_v37 = vadd.f32 %v1041_v36, %v793_v60  ;;  %v1203_v29 = vld [vmem:[%s2561_s28 + $0x178] sm:$0xff] }
 0x1bc   : > { %v1297_v31 = vsub.f32 %v1233_v1, %v1265_v4  ;;  %v1425_v32 = vadd.f32 %v1393_v5, %v1361_v2  ;;  %1328 = vst [vmem:[%s2570_s19 + $0x60] sm:$0xff] %v1296_v22  ;;  %v1106_v10 = vmax.f32 %v944_v24, 0.0  ;;  %v950_v39 = vadd.f32 %v949_v48, %v2544_v13  ;;  %v961_v12 = vpop.f32.mrb[20].mxu0  ;;  %v1057_v35 = vpop.f32.mrb[20].mxu1 }
 0x1bd   : > { %1456 = vst [vmem:[%s2570_s19 + $0x160] sm:$0xff] %v1424_v23  ;;  %v1138_v28 = vmax.f32 %v1040_v25, 0.0  ;;  %v1046_v6 = vadd.f32 %v1045_v49, %v798_v30  ;;  %v1107_v40 = vmax.f32 %v946_v33, 0.0  ;;  %v1139_v41 = vmax.f32 %v1042_v37, 0.0  ;;  %v963_v46 = vpop.f32.mrb[21].mxu0  ;;  %v1059_v47 = vpop.f32.mrb[21].mxu1 }
 0x1be   : > { %1329 = vst [vmem:[%s2570_s19 + $0x68] sm:$0xff] %v1297_v31  ;;  %1457 = vst [vmem:[%s2570_s19 + $0x168] sm:$0xff] %v1425_v32  ;;  %v952_v42 = vadd.f32 %v951_v54, %v2544_v13  ;;  %v1048_v43 = vadd.f32 %v1047_v55, %v798_v30  ;;  %v1234_v36 = vmul.f32 %v1170_v34, %v1106_v10  ;;  %v1108_v53 = vmax.f32 %v950_v39, 0.0  ;;  %v1173_v55 = vld [vmem:[%s2561_s28 + $0x88] sm:$0xff]  ;;  %v803_v22 = vpop.permute.xlu1 %802  ;;  %v808_v31 = vpop.permute.xlu0 %807 }
 0x1bf   : > { %v1362_v44 = vmul.f32 %v1202_v8, %v1106_v10  ;;  %v1266_v9 = vmul.f32 %v1202_v8, %v1138_v28  ;;  %v1394_v45 = vmul.f32 %v1170_v34, %v1138_v28  ;;  %v1235_v48 = vmul.f32 %v1171_v38, %v1107_v40  ;;  %v1174_v28 = vld [vmem:[%s2561_s28 + $0x90] sm:$0xff] }
 0x1c0   : > { %v1363_v49 = vmul.f32 %v1203_v29, %v1107_v40  ;;  %v1267_v50 = vmul.f32 %v1203_v29, %v1139_v41  ;;  %v1395_v3 = vmul.f32 %v1171_v38, %v1139_v41  ;;  %v1140_v54 = vmax.f32 %v1046_v6, 0.0  ;;  %v2652_v61 = vpop.f32.mrb[22].mxu0  ;;  %v2654_v62 = vpop.f32.mrb[22].mxu1  ;;  %v1206_v38 = vld [vmem:[%s2561_s28 + $0x190] sm:$0xff] }
 0x1c1   : > { %v1298_v13 = vsub.f32 %v1234_v36, %v1266_v9  ;;  %v1426_v52 = vadd.f32 %v1394_v45, %v1362_v44  ;;  %v1109_v59 = vmax.f32 %v952_v42, 0.0  ;;  %v1141_v60 = vmax.f32 %v1048_v43, 0.0  ;;  %v2658_v4 = vpop.f32.mrb[23].mxu0  ;;  %v2660_v5 = vpop.f32.mrb[23].mxu1  ;;  %v1207_v42 = vld [vmem:[%s2561_s28 + $0x198] sm:$0xff] }
 0x1c2   : > { %v1299_v57 = vsub.f32 %v1235_v48, %v1267_v50  ;;  %v1427_v58 = vadd.f32 %v1395_v3, %v1363_v49  ;;  %v1236_v63 = vmul.f32 %v1172_v11, %v1108_v53  ;;  %v1364_v0 = vmul.f32 %v1204_v51, %v1108_v53 }
 0x1c3   : > { %1330 = vst [vmem:[%s2570_s19 + $0x70] sm:$0xff] %v1298_v13  ;;  %1458 = vst [vmem:[%s2570_s19 + $0x170] sm:$0xff] %v1426_v52  ;;  %v1268_v1 = vmul.f32 %v1204_v51, %v1140_v54  ;;  %v1396_v2 = vmul.f32 %v1172_v11, %v1140_v54  ;;  %v1237_v23 = vmul.f32 %v1173_v55, %v1109_v59  ;;  %v1176_v13 = vld [vmem:[%s2561_s28 + $0xa0] sm:$0xff] }
 0x1c4   : > { %1331 = vst [vmem:[%s2570_s19 + $0x78] sm:$0xff] %v1299_v57  ;;  %1459 = vst [vmem:[%s2570_s19 + $0x178] sm:$0xff] %v1427_v58  ;;  %v1365_v24 = vmul.f32 %v1205_v56, %v1109_v59  ;;  %v1269_v25 = vmul.f32 %v1205_v56, %v1141_v60  ;;  %v1397_v30 = vmul.f32 %v1173_v55, %v1141_v60  ;;  %v2672_v6 = vpop.f32.mrb[24].mxu0  ;;  %v2674_v40 = vpop.f32.mrb[24].mxu1  ;;  %v1208_v52 = vld [vmem:[%s2561_s28 + $0x1a0] sm:$0xff]  ;;  %v1177_v56 = vld [vmem:[%s2561_s28 + $0xa8] sm:$0xff] }
 0x1c5   : > { %v1300_v32 = vsub.f32 %v1236_v63, %v1268_v1  ;;  %v1428_v34 = vadd.f32 %v1396_v2, %v1364_v0  ;;  %v956_v8 = vadd.f32 %v2628_v21, %v2546_v14  ;;  %v1052_v33 = vadd.f32 %v2630_v7, %v803_v22  ;;  %v1175_v7 = vld [vmem:[%s2561_s28 + $0x98] sm:$0xff]  ;;  %v2681_v44 = vpop.f32.mrb[25].mxu0  ;;  %v2683_v9 = vpop.f32.mrb[25].mxu1  ;;  %v1209_v57 = vld [vmem:[%s2561_s28 + $0x1a8] sm:$0xff] }
 0x1c6   : > { %v1301_v37 = vsub.f32 %v1237_v23, %v1269_v25  ;;  %v1429_v10 = vadd.f32 %v1397_v30, %v1365_v24  ;;  %v958_v29 = vadd.f32 %v2633_v26, %v2546_v14  ;;  %v1054_v39 = vadd.f32 %v2635_v27, %v803_v22  ;;  %v813_v2 = vpop.permute.xlu1 %812 }
 0x1c7   : > { %1332 = vst [vmem:[%s2570_s19 + $0x80] sm:$0xff] %v1300_v32  ;;  %1460 = vst [vmem:[%s2570_s19 + $0x180] sm:$0xff] %v1428_v34  ;;  %v1110_v21 = vmax.f32 %v956_v8, 0.0  ;;  %v1142_v41 = vmax.f32 %v1052_v33, 0.0  ;;  %v962_v43 = vadd.f32 %v961_v12, %v2548_v15  ;;  %v1058_v36 = vadd.f32 %v1057_v35, %v808_v31 }
 0x1c8   : > { %1333 = vst [vmem:[%s2570_s19 + $0x88] sm:$0xff] %v1301_v37  ;;  %1461 = vst [vmem:[%s2570_s19 + $0x188] sm:$0xff] %v1429_v10  ;;  %v1111_v14 = vmax.f32 %v958_v29, 0.0  ;;  %v1143_v26 = vmax.f32 %v1054_v39, 0.0  ;;  %v964_v27 = vadd.f32 %v963_v46, %v2548_v15  ;;  %v1060_v45 = vadd.f32 %v1059_v47, %v808_v31  ;;  %v2690_v53 = vpop.f32.mrb[26].mxu0  ;;  %v2692_v54 = vpop.f32.mrb[26].mxu1 }
 0x1c9   : > { %v1238_v48 = vmul.f32 %v1174_v28, %v1110_v21  ;;  %v1366_v49 = vmul.f32 %v1206_v38, %v1110_v21  ;;  %v1270_v50 = vmul.f32 %v1206_v38, %v1142_v41  ;;  %v1398_v12 = vmul.f32 %v1174_v28, %v1142_v41  ;;  %v2696_v58 = vpop.f32.mrb[27].mxu0  ;;  %v2698_v59 = vpop.f32.mrb[27].mxu1 }
 0x1ca   : > { %v1239_v35 = vmul.f32 %v1175_v7, %v1111_v14  ;;  %v1367_v3 = vmul.f32 %v1207_v42, %v1111_v14  ;;  %v1271_v11 = vmul.f32 %v1207_v42, %v1143_v26  ;;  %v1399_v51 = vmul.f32 %v1175_v7, %v1143_v26  ;;  %v818_v21 = vpop.permute.xlu0 %817  ;;  %v1178_v42 = vld [vmem:[%s2561_s28 + $0xb0] sm:$0xff]  ;;  %v1179_v26 = vld [vmem:[%s2561_s28 + $0xb8] sm:$0xff] }
 0x1cb   : > { %v1302_v15 = vsub.f32 %v1238_v48, %v1270_v50  ;;  %v1430_v46 = vadd.f32 %v1398_v12, %v1366_v49  ;;  %v1112_v47 = vmax.f32 %v962_v43, 0.0  ;;  %v1144_v55 = vmax.f32 %v1058_v36, 0.0  ;;  %v1210_v43 = vld [vmem:[%s2561_s28 + $0x1b0] sm:$0xff] }
 0x1cc   : > { %v1303_v60 = vsub.f32 %v1239_v35, %v1271_v11  ;;  %v1431_v63 = vadd.f32 %v1399_v51, %v1367_v3  ;;  %v1113_v0 = vmax.f32 %v964_v27, 0.0  ;;  %v1145_v1 = vmax.f32 %v1060_v45, 0.0  ;;  %v2704_v8 = vpop.f32.mrb[28].mxu0  ;;  %v2706_v33 = vpop.f32.mrb[28].mxu1  ;;  %v1211_v27 = vld [vmem:[%s2561_s28 + $0x1b8] sm:$0xff] }
 0x1cd   : > { %1334 = vst [vmem:[%s2570_s19 + $0x90] sm:$0xff] %v1302_v15  ;;  %1462 = vst [vmem:[%s2570_s19 + $0x190] sm:$0xff] %v1430_v46  ;;  %v1240_v22 = vmul.f32 %v1176_v13, %v1112_v47  ;;  %v1368_v23 = vmul.f32 %v1208_v52, %v1112_v47  ;;  %v1272_v24 = vmul.f32 %v1208_v52, %v1144_v55  ;;  %v2711_v29 = vpop.f32.mrb[29].mxu0  ;;  %v2713_v39 = vpop.f32.mrb[29].mxu1  ;;  %v1212_v15 = vld [vmem:[%s2561_s28 + $0x1c0] sm:$0xff] }
 0x1ce   : > { %v1400_v25 = vmul.f32 %v1176_v13, %v1144_v55  ;;  %1335 = vst [vmem:[%s2570_s19 + $0x98] sm:$0xff] %v1303_v60  ;;  %1463 = vst [vmem:[%s2570_s19 + $0x198] sm:$0xff] %v1431_v63  ;;  %v1241_v30 = vmul.f32 %v1177_v56, %v1113_v0  ;;  %v1369_v31 = vmul.f32 %v1209_v57, %v1113_v0  ;;  %v1213_v60 = vld [vmem:[%s2561_s28 + $0x1c8] sm:$0xff] }
 0x1cf   : > { %v1273_v32 = vmul.f32 %v1209_v57, %v1145_v1  ;;  %v1401_v34 = vmul.f32 %v1177_v56, %v1145_v1  ;;  %v1304_v37 = vsub.f32 %v1240_v22, %v1272_v24  ;;  %v968_v28 = vadd.f32 %v2652_v61, %v2550_v16  ;;  %v1181_v57 = vld [vmem:[%s2561_s28 + $0xc8] sm:$0xff] }
 0x1d0   : > { %v1432_v10 = vadd.f32 %v1400_v25, %v1368_v23  ;;  %v1064_v38 = vadd.f32 %v2654_v62, %v813_v2  ;;  %v970_v36 = vadd.f32 %v2658_v4, %v2550_v16  ;;  %v1066_v14 = vadd.f32 %v2660_v5, %v813_v2  ;;  %v2732_v5 = vpop.f32.mrb[30].mxu0  ;;  %v2734_v12 = vpop.f32.mrb[30].mxu1 }
 0x1d1   : > { %v1305_v41 = vsub.f32 %v1241_v30, %v1273_v32  ;;  %v1433_v7 = vadd.f32 %v1401_v34, %v1369_v31  ;;  %1336 = vst [vmem:[%s2570_s19 + $0xa0] sm:$0xff] %v1304_v37  ;;  %v1114_v61 = vmax.f32 %v968_v28, 0.0  ;;  %v974_v45 = vadd.f32 %v2672_v6, %v2552_v17  ;;  %v2736_v11 = vpop.f32.mrb[31].mxu0  ;;  %v2738_v51 = vpop.f32.mrb[31].mxu1 }
 0x1d2   : > { %1464 = vst [vmem:[%s2570_s19 + $0x1a0] sm:$0xff] %v1432_v10  ;;  %v1146_v62 = vmax.f32 %v1064_v38, 0.0  ;;  %v1070_v48 = vadd.f32 %v2674_v40, %v818_v21  ;;  %v1115_v49 = vmax.f32 %v970_v36, 0.0  ;;  %v1147_v50 = vmax.f32 %v1066_v14, 0.0  ;;  %v823_v30 = vpop.permute.xlu1 %822  ;;  %v1214_v36 = vld [vmem:[%s2561_s28 + $0x1d0] sm:$0xff] }
 0x1d3   : > { %1337 = vst [vmem:[%s2570_s19 + $0xa8] sm:$0xff] %v1305_v41  ;;  %1465 = vst [vmem:[%s2570_s19 + $0x1a8] sm:$0xff] %v1433_v7  ;;  %v976_v16 = vadd.f32 %v2681_v44, %v2552_v17  ;;  %v1072_v4 = vadd.f32 %v2683_v9, %v818_v21  ;;  %v1242_v35 = vmul.f32 %v1178_v42, %v1114_v61  ;;  %v1180_v9 = vld [vmem:[%s2561_s28 + $0xc0] sm:$0xff]  ;;  %v1116_v55 = vmax.f32 %v974_v45, 0.0  ;;  %v828_v41 = vpop.permute.xlu0 %827 }
 0x1d4   : > { %v1370_v6 = vmul.f32 %v1210_v43, %v1114_v61  ;;  %v1274_v40 = vmul.f32 %v1210_v43, %v1146_v62  ;;  %v1402_v3 = vmul.f32 %v1178_v42, %v1146_v62  ;;  %v1243_v13 = vmul.f32 %v1179_v26, %v1115_v49  ;;  %v1182_v43 = vld [vmem:[%s2561_s28 + $0xd0] sm:$0xff] }
 0x1d5   : > { %v1371_v52 = vmul.f32 %v1211_v27, %v1115_v49  ;;  %v1275_v17 = vmul.f32 %v1211_v27, %v1147_v50  ;;  %v1403_v44 = vmul.f32 %v1179_v26, %v1147_v50  ;;  %v1148_v56 = vmax.f32 %v1070_v48, 0.0  ;;  %v1183_v27 = vld [vmem:[%s2561_s28 + $0xd8] sm:$0xff] }
 0x1d6   : > { %v1306_v46 = vsub.f32 %v1242_v35, %v1274_v40  ;;  %v1434_v47 = vadd.f32 %v1402_v3, %v1370_v6  ;;  %v1117_v1 = vmax.f32 %v976_v16, 0.0  ;;  %v1149_v2 = vmax.f32 %v1072_v4, 0.0  ;;  %v1184_v40 = vld [vmem:[%s2561_s28 + $0xe0] sm:$0xff] }
 0x1d7   : > { %v1307_v63 = vsub.f32 %v1243_v13, %v1275_v17  ;;  %v1435_v0 = vadd.f32 %v1403_v44, %v1371_v52  ;;  %v1244_v22 = vmul.f32 %v1180_v9, %v1116_v55  ;;  %v1372_v23 = vmul.f32 %v1212_v15, %v1116_v55  ;;  %v1216_v3 = vld [vmem:[%s2561_s28 + $0x1e0] sm:$0xff]  ;;  %v1217_v17 = vld [vmem:[%s2561_s28 + $0x1e8] sm:$0xff] }
 0x1d8   : > { %1338 = vst [vmem:[%s2570_s19 + $0xb0] sm:$0xff] %v1306_v46  ;;  %1466 = vst [vmem:[%s2570_s19 + $0x1b0] sm:$0xff] %v1434_v47  ;;  %v1276_v24 = vmul.f32 %v1212_v15, %v1148_v56  ;;  %v1404_v25 = vmul.f32 %v1180_v9, %v1148_v56  ;;  %v1245_v31 = vmul.f32 %v1181_v57, %v1117_v1 }
 0x1d9   : > { %1339 = vst [vmem:[%s2570_s19 + $0xb8] sm:$0xff] %v1307_v63  ;;  %1467 = vst [vmem:[%s2570_s19 + $0x1b8] sm:$0xff] %v1435_v0  ;;  %v1373_v32 = vmul.f32 %v1213_v60, %v1117_v1  ;;  %v1277_v34 = vmul.f32 %v1213_v60, %v1149_v2  ;;  %v1405_v37 = vmul.f32 %v1181_v57, %v1149_v2  ;;  %v833_v60 = vpop.permute.xlu1 %832 }
 0x1da   : > { %v1308_v10 = vsub.f32 %v1244_v22, %v1276_v24  ;;  %v1436_v28 = vadd.f32 %v1404_v25, %v1372_v23  ;;  %v980_v38 = vadd.f32 %v2690_v53, %v2554_v18  ;;  %v1076_v21 = vadd.f32 %v2692_v54, %v823_v30  ;;  %v1215_v53 = vld [vmem:[%s2561_s28 + $0x1d8] sm:$0xff] }
 0x1db   : > { %v1309_v7 = vsub.f32 %v1245_v31, %v1277_v34  ;;  %v1437_v42 = vadd.f32 %v1405_v37, %v1373_v32  ;;  %v982_v14 = vadd.f32 %v2696_v58, %v2554_v18  ;;  %v1078_v61 = vadd.f32 %v2698_v59, %v823_v30  ;;  %v1186_v32 = vld [vmem:[%s2561_s28 + $0xf0] sm:$0xff] }
 0x1dc   : > { %1340 = vst [vmem:[%s2570_s19 + $0xc0] sm:$0xff] %v1308_v10  ;;  %1468 = vst [vmem:[%s2570_s19 + $0x1c0] sm:$0xff] %v1436_v28  ;;  %v1118_v62 = vmax.f32 %v980_v38, 0.0  ;;  %v1150_v26 = vmax.f32 %v1076_v21, 0.0  ;;  %v986_v54 = vadd.f32 %v2704_v8, %v2556_v19  ;;  %v1082_v45 = vadd.f32 %v2706_v33, %v828_v41  ;;  %v1218_v34 = vld [vmem:[%s2561_s28 + $0x1f0] sm:$0xff]  ;;  %v1187_v21 = vld [vmem:[%s2561_s28 + $0xf8] sm:$0xff] }
 0x1dd   : > { %1341 = vst [vmem:[%s2570_s19 + $0xc8] sm:$0xff] %v1309_v7  ;;  %1469 = vst [vmem:[%s2570_s19 + $0x1c8] sm:$0xff] %v1437_v42  ;;  %v1119_v48 = vmax.f32 %v982_v14, 0.0  ;;  %v1151_v49 = vmax.f32 %v1078_v61, 0.0  ;;  %v988_v18 = vadd.f32 %v2711_v29, %v2556_v19  ;;  %v1084_v58 = vadd.f32 %v2713_v39, %v828_v41  ;;  %v1185_v39 = vld [vmem:[%s2561_s28 + $0xe8] sm:$0xff]  ;;  %v1219_v41 = vld [vmem:[%s2561_s28 + $0x1f8] sm:$0xff] }
 0x1de   : > { %v1246_v59 = vmul.f32 %v1182_v43, %v1118_v62  ;;  %v1374_v50 = vmul.f32 %v1214_v36, %v1118_v62  ;;  %v1278_v16 = vmul.f32 %v1214_v36, %v1150_v26  ;;  %v1406_v4 = vmul.f32 %v1182_v43, %v1150_v26 }
 0x1df   : > { %v1247_v8 = vmul.f32 %v1183_v27, %v1119_v48  ;;  %v1375_v35 = vmul.f32 %v1215_v53, %v1119_v48  ;;  %v1279_v33 = vmul.f32 %v1215_v53, %v1151_v49  ;;  %v1407_v6 = vmul.f32 %v1183_v27, %v1151_v49 }
 0x1e0   : > { %v1310_v13 = vsub.f32 %v1246_v59, %v1278_v16  ;;  %v1438_v52 = vadd.f32 %v1406_v4, %v1374_v50  ;;  %v1120_v19 = vmax.f32 %v986_v54, 0.0  ;;  %v1152_v29 = vmax.f32 %v1082_v45, 0.0 }
 0x1e1   : > { %v1311_v44 = vsub.f32 %v1247_v8, %v1279_v33  ;;  %v1439_v9 = vadd.f32 %v1407_v6, %v1375_v35  ;;  %v1121_v15 = vmax.f32 %v988_v18, 0.0  ;;  %v1153_v46 = vmax.f32 %v1084_v58, 0.0 }
 0x1e2   : > { %1342 = vst [vmem:[%s2570_s19 + $0xd0] sm:$0xff] %v1310_v13  ;;  %1470 = vst [vmem:[%s2570_s19 + $0x1d0] sm:$0xff] %v1438_v52  ;;  %v1248_v47 = vmul.f32 %v1184_v40, %v1120_v19  ;;  %v1376_v55 = vmul.f32 %v1216_v3, %v1120_v19  ;;  %v1280_v56 = vmul.f32 %v1216_v3, %v1152_v29 }
 0x1e3   : > { %v1408_v57 = vmul.f32 %v1184_v40, %v1152_v29  ;;  %1343 = vst [vmem:[%s2570_s19 + $0xd8] sm:$0xff] %v1311_v44  ;;  %1471 = vst [vmem:[%s2570_s19 + $0x1d8] sm:$0xff] %v1439_v9  ;;  %v1249_v63 = vmul.f32 %v1185_v39, %v1121_v15  ;;  %v1377_v0 = vmul.f32 %v1217_v17, %v1121_v15 }
 0x1e4   : > { %v1281_v1 = vmul.f32 %v1217_v17, %v1153_v46  ;;  %v1409_v2 = vmul.f32 %v1185_v39, %v1153_v46  ;;  %v1312_v22 = vsub.f32 %v1248_v47, %v1280_v56  ;;  %v992_v24 = vadd.f32 %v2732_v5, %v2558_v20 }
 0x1e5   : > { %v1440_v23 = vadd.f32 %v1408_v57, %v1376_v55  ;;  %v1088_v25 = vadd.f32 %v2734_v12, %v833_v60  ;;  %v994_v37 = vadd.f32 %v2736_v11, %v2558_v20  ;;  %v1090_v10 = vadd.f32 %v2738_v51, %v833_v60 }
 0x1e6   : > { %v1313_v30 = vsub.f32 %v1249_v63, %v1281_v1  ;;  %v1441_v31 = vadd.f32 %v1409_v2, %v1377_v0  ;;  %1344 = vst [vmem:[%s2570_s19 + $0xe0] sm:$0xff] %v1312_v22  ;;  %v1122_v28 = vmax.f32 %v992_v24, 0.0 }
 0x1e7   : > { %1472 = vst [vmem:[%s2570_s19 + $0x1e0] sm:$0xff] %v1440_v23  ;;  %v1154_v38 = vmax.f32 %v1088_v25, 0.0  ;;  %v1123_v5 = vmax.f32 %v994_v37, 0.0  ;;  %v1155_v12 = vmax.f32 %v1090_v10, 0.0 }
 0x1e8   : > { %1345 = vst [vmem:[%s2570_s19 + $0xe8] sm:$0xff] %v1313_v30  ;;  %1473 = vst [vmem:[%s2570_s19 + $0x1e8] sm:$0xff] %v1441_v31  ;;  %v1250_v7 = vmul.f32 %v1186_v32, %v1122_v28  ;;  %v1378_v42 = vmul.f32 %v1218_v34, %v1122_v28 }
 0x1e9   : > { %v1282_v20 = vmul.f32 %v1218_v34, %v1154_v38  ;;  %v1410_v11 = vmul.f32 %v1186_v32, %v1154_v38  ;;  %v1251_v51 = vmul.f32 %v1187_v21, %v1123_v5  ;;  %v1379_v43 = vmul.f32 %v1219_v41, %v1123_v5 }
 0x1ea   : > { %v1283_v36 = vmul.f32 %v1219_v41, %v1155_v12  ;;  %v1411_v14 = vmul.f32 %v1187_v21, %v1155_v12 }
 0x1eb   : > { %v1314_v61 = vsub.f32 %v1250_v7, %v1282_v20  ;;  %v1442_v62 = vadd.f32 %v1410_v11, %v1378_v42 }
 0x1ec   : > { %v1315_v26 = vsub.f32 %v1251_v51, %v1283_v36  ;;  %v1443_v27 = vadd.f32 %v1411_v14, %v1379_v43 }
 0x1ed   : > { %1346 = vst [vmem:[%s2570_s19 + $0xf0] sm:$0xff] %v1314_v61  ;;  %1474 = vst [vmem:[%s2570_s19 + $0x1f0] sm:$0xff] %v1442_v62 }
 0x1ee   : > { %1347 = vst [vmem:[%s2570_s19 + $0xf8] sm:$0xff] %v1315_v26  ;;  %1475 = vst [vmem:[%s2570_s19 + $0x1f8] sm:$0xff] %v1443_v27 }
 0x1ef   : > { %1920 = shalt.err (!%p1917_p11)
}
 0x1f0   : > { %s1921_s14 = scalar_lea.hbm %s2795_s23, 8192  ;;  %s1925_s26 = scalar_lea.hbm %s2857_s5, 16384 }
 0x1f1   : > { %p1922_p9 = scmp.ne.s32.totalorder %s2795_s23, %s1921_s14  ;;  %p1926_p1 = scmp.lt.u32.totalorder %s2795_s23, %s2857_s5 }
 0x1f2   : > { %p1927_p7 = scmp.lt.u32.totalorder %s1925_s26, %s1921_s14  ;;  %p1929_p10 = scmp.lt.u32.totalorder %s1921_s14, %s2795_s23 }
 0x1f3   : > { %p1923_p8 = pnand %p1922_p9, %p2878_p2 }
 0x1f4   : > { %p1928_p13 = por %p1927_p7, %p1926_p1 }
 0x1f5   : > { %p1924_p6 = pneg %p1923_p8 }
 0x1f6   : > { %p1930_p12 = por %p1929_p10, %p1928_p13 }
 0x1f8   : > { %p1931_p0 = pnand %p1930_p12, %p1924_p6 }
 0x1fa   : > { %1934 = shalt.err (!%p1931_p0)
}
 0x1fb   : > { %s2002_s19 = smov 256   ;;  %s2003_s9 = smov 16  }
 0x1fc   : > { %1742 = dma.vmem_to_hbm [thread:$0]  (%p2878_p2), %s2797_s16, 8192, %s2795_s23, %s2805_s30, %s2002_s19, %s2002_s19, %s2003_s9  }
 0x1fd PF: > { %s1507_s27 = sand.u32 1, %s1973_s20   ;;  %p2879_p4 = scmp.ne.s32.totalorder %s2868_s13, 0 }
 0x1fe   : > { %p2880_p3 = scmp.ge.s32.totalorder %s1993_s25, 2  ;;  %s1508_s11 = scalar_lea.sflag [#allocation5], %s1507_s27 }
 0x200   : > { %p1756_p5 = pnand %p2880_p3, %p2879_p4 }
 0x202   : > { %1968 = dma.done.wait (!%p1756_p5), %s1508_s11, 8192  }
 0x203   : > { %1970 = vsyncadd (!%p1756_p5), %s1508_s11, 4294959104  ;;  %s23_s25 = sadd.s32 1, %s1993_s25   ;;  %s2881_s20 = smov %s1977_s21 }
 0x204   : > { %p20_p11 = scmp.ge.s32.totalorder %s23_s25, 4   ;;  %s2882_s21 = smov %s1981_s22 }
 0x205   : > { %s2883_s22 = smov %s2088_s6  ;;  %s2884_s23 = smov %s1989_s24 }
 0x206   : > { %s2885_s24 = smov %s2887_s0  ;;  %22 = sbr.rel (!%p20_p11) target bundleno = 9 (0x9), region = 101 }
 0x20d   :  { %1513 = vsyncpa [#allocation4], 1 }
 0x20e   :  { %1515 = vsyncpa [#allocation4 + $0x1], 1 }
 0x20f   :  { %1516 = vsyncpa [#allocation7], 1 }
 0x210   :  { %1518 = vsyncpa [#allocation7 + $0x1], 1 }
 0x211   :  { %1519 = vsyncpa [#allocation5], 1 }
 0x212   :  { %1521 = vsyncpa [#allocation5 + $0x1], 1 }

</bundles_post_ra>
